<compile_context>
chip_gen: v5e
topology: v5e:2x2
jax: 0.10.0
libtpu: 0.0.40
codegen_flags: <defaults>
</compile_context>

<pallas_src>
import functools

import jax
import jax.numpy as jnp
import numpy as np
from jax import lax
from jax.experimental import pallas as pl
from jax.experimental.pallas import tpu as pltpu


def _ceil_to(x, m):
    return (x + m - 1) // m * m


def _layout(H, W):
    """Static lane-layout constants for the padded-flat activation format."""
    Wp, Hp = W + 2, H + 2
    Npad = Hp * Wp
    q0 = Wp + 1                       # padded flat index of interior pixel (0,0)
    Q0 = _ceil_to(q0, 128)            # lane of interior pixel (0,0): 128-aligned
    origin = Q0 - q0                  # lane holding padded flat index 0
    Lc = H * Wp                       # contiguous strip covering all interiors
    Lc_pad = _ceil_to(Lc, 128)        # lane-dense strip length (full vregs)
    Ltot = _ceil_to(Q0 + Lc_pad + Wp + 1, 128)   # max tap read stays in bounds
    return Wp, Hp, Npad, q0, Q0, origin, Lc, Lc_pad, Ltot


# ----------------------------------------------------------------------------
# Pallas kernel: full IBasicBlock forward for one image.
# ----------------------------------------------------------------------------
def ibasic_block_kernel(x_ref,      # (C, Ltot)   bf16  padded-flat input image
                        w1_ref,     # (C, 9*C)    bf16  conv1 weights (Cout, 9*Cin)
                        w2_ref,     # (C, 9*C)    bf16  conv2 weights
                        pp_ref,     # (C, 8)      f32   packed per-channel params
                        mask_ref,   # (1, Ltot)   f32   1.0 at interior pixels
                        out_ref,    # (C, Ltot)   bf16  padded-flat output
                        xp_ref,     # scratch (C, Ltot)      bf16  padded activation
                        col_ref,    # scratch (9*C, Lc_pad)  bf16  im2col buffer
                        *, H, W):
    Wp, _, _, _, Q0, origin, _, Lc_pad, _ = _layout(H, W)
    C, Ltot = x_ref.shape
    f32 = jnp.float32

    s1 = pp_ref[:, 0:1]; o1 = pp_ref[:, 1:2]     # (C, 1) folded BN / PReLU params
    s2 = pp_ref[:, 2:3]; o2 = pp_ref[:, 3:4]
    al = pp_ref[:, 4:5]
    s3 = pp_ref[:, 5:6]; o3 = pp_ref[:, 6:7]

    mask_full = mask_ref[...]                     # (1, Ltot) f32
    mask_strip = mask_ref[:, Q0:Q0 + Lc_pad]      # (1, Lc_pad) f32, lane-aligned

    # --- bn1 (eval, f32); mask keeps every non-interior lane exactly zero ----
    x_full = x_ref[...].astype(f32)
    xp_ref[...] = ((x_full * s1 + o1) * mask_full).astype(xp_ref.dtype)

    def im2col(src_ref):
        # 9 lane-shifted tap slices -> (9*C, Lc_pad) scratch.  Stores are
        # lane-dense and sublane-tile aligned (use C a multiple of 16 for clean
        # bf16 packing); the shifted loads are the unavoidable halo reads.
        for kh in range(3):
            for kw in range(3):
                t = kh * 3 + kw
                s = origin + kh * Wp + kw
                col_ref[t * C:(t + 1) * C, :] = src_ref[:, s:s + Lc_pad]

    # --- conv1 as ONE MXU dot (K = 9*Cin) -> bn2 -> PReLU (f32) --------------
    im2col(xp_ref)
    acc1 = jnp.dot(w1_ref[...], col_ref[...], preferred_element_type=f32)
    h1 = acc1 * s2 + o2
    h1 = jnp.where(h1 >= 0, h1, al * h1)
    h1 = h1 * mask_strip                          # re-zero pad columns for conv2
    # Lane-aligned dense store; xp_ref margins still hold zeros from the bn1
    # full-width store, so xp_ref is again a valid zero-padded conv input.
    xp_ref[:, Q0:Q0 + Lc_pad] = h1.astype(xp_ref.dtype)

    # --- conv2 as ONE MXU dot -> bn3 -> residual add (identity = original x) -
    im2col(xp_ref)
    acc2 = jnp.dot(w2_ref[...], col_ref[...], preferred_element_type=f32)
    x_res = x_ref[:, Q0:Q0 + Lc_pad].astype(f32)
    # Final mask makes the output a valid padded-flat input for a chained block
    # (pad-column lanes inside the strip are exactly zero).
    out = (acc2 * s3 + o3 + x_res) * mask_strip

    out_ref[:, :Q0] = jnp.zeros((C, Q0), out_ref.dtype)
    out_ref[:, Q0 + Lc_pad:] = jnp.zeros((C, Ltot - Q0 - Lc_pad), out_ref.dtype)
    out_ref[:, Q0:Q0 + Lc_pad] = out.astype(out_ref.dtype)


# ----------------------------------------------------------------------------
# Glue: parameter folding / layout plumbing (plain JAX).
# ----------------------------------------------------------------------------
def _fold_bn(gamma, beta, mean, var, eps=1e-5):
    s = gamma / jnp.sqrt(var + eps)
    return s, beta - mean * s


def _vmem_budget_bytes(C, Ltot, Lc_pad):
    f32, bf16 = 4, 2
    r = _ceil_to
    x_blk = r(C, 16) * r(Ltot, 128) * bf16           # double-buffered
    o_blk = x_blk                                     # double-buffered
    w_blk = r(C, 16) * r(9 * C, 128) * bf16           # single-buffered (Buffered(1))
    pp_blk = r(C, 8) * 128 * f32                      # single-buffered
    m_blk = 8 * r(Ltot, 128) * f32                    # single-buffered
    xp_s = r(C, 16) * r(Ltot, 128) * bf16
    col_s = r(9 * C, 16) * r(Lc_pad, 128) * bf16
    live = 3 * r(C, 8) * r(Lc_pad, 128) * f32         # f32 acc / h1 / out temporaries
    total = 2 * (x_blk + o_blk) + 2 * w_blk + pp_blk + m_blk + xp_s + col_s + live
    # v7x has only 64 MiB physical VMEM per core: stay <= 56 MiB and leave
    # headroom for compiler-internal scratch instead of clamping at the limit.
    return int(min(56 * 1024 * 1024, total + (8 << 20)))


def to_padded_flat(x_nchw):
    """NCHW -> persistent padded-flat (N, C, Ltot) bf16 layout (zeros elsewhere)."""
    N, C, H, W = x_nchw.shape
    _, _, Npad, _, _, origin, _, _, Ltot = _layout(H, W)
    xpad = jnp.pad(x_nchw.astype(jnp.bfloat16), ((0, 0), (0, 0), (1, 1), (1, 1)))
    xflat = xpad.reshape(N, C, Npad)
    return jnp.pad(xflat, ((0, 0), (0, 0), (origin, Ltot - origin - Npad)))


def from_padded_flat(out_flat, H, W):
    """Persistent padded-flat layout -> NCHW (drop pad ring + lane margins)."""
    N, C, _ = out_flat.shape
    Wp, Hp, Npad, _, _, origin, _, _, _ = _layout(H, W)
    img = out_flat[:, :, origin:origin + Npad].reshape(N, C, Hp, Wp)
    return img[:, :, 1:H + 1, 1:W + 1]


def ibasic_block_padded(x_flat, params, *, H, W):
    """IBasicBlock.forward on the padded-flat bf16 layout (stride=1, no downsample).

    Chain multiple blocks by calling this back-to-back: the output is itself a
    valid padded-flat input (no pad / crop HBM passes between blocks).
    """
    N, C, Ltot = x_flat.shape
    Wp, Hp, Npad, _, _, origin, _, Lc_pad, Ltot_chk = _layout(H, W)
    assert Ltot == Ltot_chk
    Cout = params["conv1_w"].shape[0]
    assert Cout == C, "downsample=None requires inplanes == planes"
    # TODO(synk): stride > 1 / downsample branch not implemented.

    # conv weights OIHW -> (Cout, 9*Cin) with K index = (kh*3+kw)*Cin + cin,
    # matching the im2col row order; bf16 for the MXU.
    def flatten_w(w):
        return (jnp.transpose(w.astype(jnp.float32), (0, 2, 3, 1))
                .reshape(Cout, 9 * C).astype(jnp.bfloat16))

    w1 = flatten_w(params["conv1_w"])
    w2 = flatten_w(params["conv2_w"])

    # folded BN (eval) + PReLU alpha packed into one (C, 8) per-channel table.
    s1, o1 = _fold_bn(*params["bn1"])
    s2, o2 = _fold_bn(*params["bn2"])
    s3, o3 = _fold_bn(*params["bn3"])
    alpha = params["prelu_alpha"].astype(jnp.float32)
    pp = jnp.stack([s1, o1, s2, o2, alpha, s3, o3, jnp.zeros_like(s1)],
                   axis=1).astype(jnp.float32)                      # (C, 8)

    # interior-pixel mask in the padded-flat layout.
    m = jnp.zeros((Hp, Wp), jnp.float32).at[1:H + 1, 1:W + 1].set(1.0)
    mask = jnp.pad(m.reshape(1, Npad), ((0, 0), (origin, Ltot - origin - Npad)))

    kernel = functools.partial(ibasic_block_kernel, H=H, W=W)
    const = pl.Buffered(1)   # grid-invariant inputs: no second VMEM copy / DMA

    out_flat = pl.pallas_call(
        kernel,
        out_shape=jax.ShapeDtypeStruct((N, C, Ltot), jnp.bfloat16),
        grid_spec=pltpu.PrefetchScalarGridSpec(
            num_scalar_prefetch=0,
            grid=(N,),
            in_specs=[
                pl.BlockSpec((None, C, Ltot), lambda n: (n, 0, 0)),          # x
                pl.BlockSpec((C, 9 * C), lambda n: (0, 0), pipeline_mode=const),
                pl.BlockSpec((C, 9 * C), lambda n: (0, 0), pipeline_mode=const),
                pl.BlockSpec((C, 8), lambda n: (0, 0), pipeline_mode=const),
                pl.BlockSpec((1, Ltot), lambda n: (0, 0), pipeline_mode=const),
            ],
            out_specs=pl.BlockSpec((None, C, Ltot), lambda n: (n, 0, 0)),
            scratch_shapes=[
                pltpu.VMEM((C, Ltot), jnp.bfloat16),          # padded activation
                pltpu.VMEM((9 * C, Lc_pad), jnp.bfloat16),    # im2col buffer
            ],
        ),
        compiler_params=pltpu.CompilerParams(
            dimension_semantics=("parallel",),
            vmem_limit_bytes=_vmem_budget_bytes(C, Ltot, Lc_pad),
        ),
    )(x_flat, w1, w2, pp, mask)
    return out_flat


@jax.jit
def ibasic_block_forward(x_nchw, params):
    """Module-equivalent interface: NCHW f32 in, NCHW f32 out (bf16 internally)."""
    N, C, H, W = x_nchw.shape
    x_flat = to_padded_flat(x_nchw)
    out_flat = ibasic_block_padded(x_flat, params, H=H, W=W)
    return from_padded_flat(out_flat, H, W).astype(jnp.float32)


# ----------------------------------------------------------------------------
# Pure-JAX reference (for correctness check; f32 throughout).
# ----------------------------------------------------------------------------
def ibasic_block_reference(x_nchw, params, eps=1e-5):
    def bn(v_nhwc, p):
        g, b, m, var = p
        return (v_nhwc - m) / jnp.sqrt(var + eps) * g + b

    x = jnp.transpose(x_nchw, (0, 2, 3, 1)).astype(jnp.float32)   # NHWC
    w1 = jnp.transpose(params["conv1_w"], (2, 3, 1, 0)).astype(jnp.float32)
    w2 = jnp.transpose(params["conv2_w"], (2, 3, 1, 0)).astype(jnp.float32)

    h = bn(x, params["bn1"])
    h = lax.conv_general_dilated(h, w1, (1, 1), [(1, 1), (1, 1)],
                                 dimension_numbers=("NHWC", "HWIO", "NHWC"))
    h = bn(h, params["bn2"])
    h = jnp.where(h >= 0, h, params["prelu_alpha"] * h)
    h = lax.conv_general_dilated(h, w2, (1, 1), [(1, 1), (1, 1)],
                                 dimension_numbers=("NHWC", "HWIO", "NHWC"))
    h = bn(h, params["bn3"])
    out = h + x
    return jnp.transpose(out, (0, 3, 1, 2))                       # NCHW


# ----------------------------------------------------------------------------
# Deterministic parameter construction + run.
# ----------------------------------------------------------------------------
def make_params(key, inplanes, planes):
    ks = jax.random.split(key, 16)

    def bn_params(k, c):
        k1, k2, k3, k4 = jax.random.split(k, 4)
        gamma = jax.random.uniform(k1, (c,), jnp.float32, 0.5, 1.5)
        beta = 0.1 * jax.random.normal(k2, (c,), jnp.float32)
        mean = 0.1 * jax.random.normal(k3, (c,), jnp.float32)
        var = jax.random.uniform(k4, (c,), jnp.float32, 0.5, 1.5)
        return (gamma, beta, mean, var)

    return {
        "bn1": bn_params(ks[0], inplanes),
        "conv1_w": 0.1 * jax.random.normal(ks[1], (planes, inplanes, 3, 3),
                                           jnp.float32),          # OIHW
        "bn2": bn_params(ks[2], planes),
        "prelu_alpha": 0.25 + 0.05 * jax.random.normal(ks[3], (planes,),
                                                       jnp.float32),
        "conv2_w": 0.1 * jax.random.normal(ks[4], (planes, planes, 3, 3),
                                           jnp.float32),          # OIHW
        "bn3": bn_params(ks[5], planes),
    }


if __name__ == "__main__":
    key = jax.random.PRNGKey(0)
    k_x, k_p = jax.random.split(key)

    # inplanes = planes = 16 (downsample=None); C is a multiple of 16 so bf16
    # sublane packing of the im2col scratch is tile-aligned.
    N, C, H, W = 2, 16, 16, 16
    x = jax.random.normal(k_x, (N, C, H, W), jnp.float32)
    params = make_params(k_p, C, C)

    out = jax.block_until_ready(ibasic_block_forward(x, params))
    ref = jax.block_until_ready(ibasic_block_reference(x, params))

    # Intentional inference precision contract: activations / weights / I/O are
    # bf16 on the MXU and across the pallas_call boundary (accumulation and
    # BN/PReLU/residual math in f32), hence the bf16-scale tolerance.
    np.testing.assert_allclose(np.asarray(out), np.asarray(ref),
                               rtol=5e-2, atol=5e-2)

    print("KERNEL_OK")
</pallas_src>

<mosaic_0001>
module attributes {stable_mosaic.version = 11 : i64} {
  func.func @ibasic_block_kernel(%arg0: i32, %arg1: memref<1x16x640xbf16, #tpu.memory_space<vmem>>, %arg2: memref<16x144xbf16, #tpu.memory_space<vmem>>, %arg3: memref<16x144xbf16, #tpu.memory_space<vmem>>, %arg4: memref<16x8xf32, #tpu.memory_space<vmem>>, %arg5: memref<1x640xf32, #tpu.memory_space<vmem>>, %arg6: memref<1x16x640xbf16, #tpu.memory_space<vmem>>, %arg7: memref<16x640xbf16, #tpu.memory_space<vmem>>, %arg8: memref<144x384xbf16, #tpu.memory_space<vmem>>) attributes {dimension_semantics = [#tpu.dimension_semantics<parallel>], iteration_bounds = array<i64: 2>, scalar_prefetch = 0 : i64, scratch_operands = 2 : i64, tpu.core_type = #tpu.core_type<tc>, window_params = [{transform_indices = @transform_0, window_bounds = array<i64: 1, 16, 640>}, {pipeline_mode = #tpu.pipeline_mode<synchronous>, transform_indices = @transform_1, window_bounds = array<i64: 16, 144>}, {pipeline_mode = #tpu.pipeline_mode<synchronous>, transform_indices = @transform_2, window_bounds = array<i64: 16, 144>}, {pipeline_mode = #tpu.pipeline_mode<synchronous>, transform_indices = @transform_3, window_bounds = array<i64: 16, 8>}, {pipeline_mode = #tpu.pipeline_mode<synchronous>, transform_indices = @transform_4, window_bounds = array<i64: 1, 640>}, {transform_indices = @transform_5, window_bounds = array<i64: 1, 16, 640>}]} {
    %c0 = arith.constant 0 : index
    %c0_0 = arith.constant 0 : index
    %0 = vector.load %arg4[%c0, %c0_0] : memref<16x8xf32, #tpu.memory_space<vmem>>, vector<16x1xf32>
    %c0_1 = arith.constant 0 : index
    %c1 = arith.constant 1 : index
    %1 = vector.load %arg4[%c0_1, %c1] : memref<16x8xf32, #tpu.memory_space<vmem>>, vector<16x1xf32>
    %c0_2 = arith.constant 0 : index
    %c2 = arith.constant 2 : index
    %2 = vector.load %arg4[%c0_2, %c2] : memref<16x8xf32, #tpu.memory_space<vmem>>, vector<16x1xf32>
    %c0_3 = arith.constant 0 : index
    %c3 = arith.constant 3 : index
    %3 = vector.load %arg4[%c0_3, %c3] : memref<16x8xf32, #tpu.memory_space<vmem>>, vector<16x1xf32>
    %c0_4 = arith.constant 0 : index
    %c4 = arith.constant 4 : index
    %4 = vector.load %arg4[%c0_4, %c4] : memref<16x8xf32, #tpu.memory_space<vmem>>, vector<16x1xf32>
    %c0_5 = arith.constant 0 : index
    %c5 = arith.constant 5 : index
    %5 = vector.load %arg4[%c0_5, %c5] : memref<16x8xf32, #tpu.memory_space<vmem>>, vector<16x1xf32>
    %c0_6 = arith.constant 0 : index
    %c6 = arith.constant 6 : index
    %6 = vector.load %arg4[%c0_6, %c6] : memref<16x8xf32, #tpu.memory_space<vmem>>, vector<16x1xf32>
    %c0_7 = arith.constant 0 : index
    %c0_8 = arith.constant 0 : index
    %7 = vector.load %arg5[%c0_7, %c0_8] : memref<1x640xf32, #tpu.memory_space<vmem>>, vector<1x640xf32>
    %c0_9 = arith.constant 0 : index
    %c128 = arith.constant 128 : index
    %8 = vector.load %arg5[%c0_9, %c128] : memref<1x640xf32, #tpu.memory_space<vmem>>, vector<1x384xf32>
    %c0_10 = arith.constant 0 : index
    %c0_11 = arith.constant 0 : index
    %c0_12 = arith.constant 0 : index
    %9 = vector.load %arg1[%c0_10, %c0_11, %c0_12] : memref<1x16x640xbf16, #tpu.memory_space<vmem>>, vector<1x16x640xbf16>
    %10 = vector.shape_cast %9 : vector<1x16x640xbf16> to vector<16x640xbf16>
    %11 = arith.extf %10 : vector<16x640xbf16> to vector<16x640xf32>
    %12 = vector.broadcast %0 : vector<16x1xf32> to vector<16x640xf32>
    %13 = arith.mulf %11, %12 : vector<16x640xf32>
    %14 = vector.broadcast %1 : vector<16x1xf32> to vector<16x640xf32>
    %15 = arith.addf %13, %14 : vector<16x640xf32>
    %16 = vector.broadcast %7 : vector<1x640xf32> to vector<16x640xf32>
    %17 = arith.mulf %15, %16 : vector<16x640xf32>
    %18 = arith.truncf %17 : vector<16x640xf32> to vector<16x640xbf16>
    %c0_13 = arith.constant 0 : index
    %c0_14 = arith.constant 0 : index
    %19 = vector.load %arg7[%c0_13, %c0_14] : memref<16x640xbf16, #tpu.memory_space<vmem>>, vector<16x640xbf16>
    tpu.vector_store %arg7[%c0_13, %c0_14], %18 {strides = array<i32>} : memref<16x640xbf16, #tpu.memory_space<vmem>>, vector<16x640xbf16>,
    %c0_15 = arith.constant 0 : index
    %c109 = arith.constant 109 : index
    %20 = vector.load %arg7[%c0_15, %c109] : memref<16x640xbf16, #tpu.memory_space<vmem>>, vector<16x384xbf16>
    %c0_16 = arith.constant 0 : index
    %c0_17 = arith.constant 0 : index
    %21 = vector.load %arg8[%c0_16, %c0_17] : memref<144x384xbf16, #tpu.memory_space<vmem>>, vector<16x384xbf16>
    tpu.vector_store %arg8[%c0_16, %c0_17], %20 {strides = array<i32>} : memref<144x384xbf16, #tpu.memory_space<vmem>>, vector<16x384xbf16>,
    %c0_18 = arith.constant 0 : index
    %c110 = arith.constant 110 : index
    %22 = vector.load %arg7[%c0_18, %c110] : memref<16x640xbf16, #tpu.memory_space<vmem>>, vector<16x384xbf16>
    %c16 = arith.constant 16 : index
    %c0_19 = arith.constant 0 : index
    %23 = vector.load %arg8[%c16, %c0_19] : memref<144x384xbf16, #tpu.memory_space<vmem>>, vector<16x384xbf16>
    tpu.vector_store %arg8[%c16, %c0_19], %22 {strides = array<i32>} : memref<144x384xbf16, #tpu.memory_space<vmem>>, vector<16x384xbf16>,
    %c0_20 = arith.constant 0 : index
    %c111 = arith.constant 111 : index
    %24 = vector.load %arg7[%c0_20, %c111] : memref<16x640xbf16, #tpu.memory_space<vmem>>, vector<16x384xbf16>
    %c32 = arith.constant 32 : index
    %c0_21 = arith.constant 0 : index
    %25 = vector.load %arg8[%c32, %c0_21] : memref<144x384xbf16, #tpu.memory_space<vmem>>, vector<16x384xbf16>
    tpu.vector_store %arg8[%c32, %c0_21], %24 {strides = array<i32>} : memref<144x384xbf16, #tpu.memory_space<vmem>>, vector<16x384xbf16>,
    %c0_22 = arith.constant 0 : index
    %c127 = arith.constant 127 : index
    %26 = vector.load %arg7[%c0_22, %c127] : memref<16x640xbf16, #tpu.memory_space<vmem>>, vector<16x384xbf16>
    %c48 = arith.constant 48 : index
    %c0_23 = arith.constant 0 : index
    %27 = vector.load %arg8[%c48, %c0_23] : memref<144x384xbf16, #tpu.memory_space<vmem>>, vector<16x384xbf16>
    tpu.vector_store %arg8[%c48, %c0_23], %26 {strides = array<i32>} : memref<144x384xbf16, #tpu.memory_space<vmem>>, vector<16x384xbf16>,
    %c0_24 = arith.constant 0 : index
    %c128_25 = arith.constant 128 : index
    %28 = vector.load %arg7[%c0_24, %c128_25] : memref<16x640xbf16, #tpu.memory_space<vmem>>, vector<16x384xbf16>
    %c64 = arith.constant 64 : index
    %c0_26 = arith.constant 0 : index
    %29 = vector.load %arg8[%c64, %c0_26] : memref<144x384xbf16, #tpu.memory_space<vmem>>, vector<16x384xbf16>
    tpu.vector_store %arg8[%c64, %c0_26], %28 {strides = array<i32>} : memref<144x384xbf16, #tpu.memory_space<vmem>>, vector<16x384xbf16>,
    %c0_27 = arith.constant 0 : index
    %c129 = arith.constant 129 : index
    %30 = vector.load %arg7[%c0_27, %c129] : memref<16x640xbf16, #tpu.memory_space<vmem>>, vector<16x384xbf16>
    %c80 = arith.constant 80 : index
    %c0_28 = arith.constant 0 : index
    %31 = vector.load %arg8[%c80, %c0_28] : memref<144x384xbf16, #tpu.memory_space<vmem>>, vector<16x384xbf16>
    tpu.vector_store %arg8[%c80, %c0_28], %30 {strides = array<i32>} : memref<144x384xbf16, #tpu.memory_space<vmem>>, vector<16x384xbf16>,
    %c0_29 = arith.constant 0 : index
    %c145 = arith.constant 145 : index
    %32 = vector.load %arg7[%c0_29, %c145] : memref<16x640xbf16, #tpu.memory_space<vmem>>, vector<16x384xbf16>
    %c96 = arith.constant 96 : index
    %c0_30 = arith.constant 0 : index
    %33 = vector.load %arg8[%c96, %c0_30] : memref<144x384xbf16, #tpu.memory_space<vmem>>, vector<16x384xbf16>
    tpu.vector_store %arg8[%c96, %c0_30], %32 {strides = array<i32>} : memref<144x384xbf16, #tpu.memory_space<vmem>>, vector<16x384xbf16>,
    %c0_31 = arith.constant 0 : index
    %c146 = arith.constant 146 : index
    %34 = vector.load %arg7[%c0_31, %c146] : memref<16x640xbf16, #tpu.memory_space<vmem>>, vector<16x384xbf16>
    %c112 = arith.constant 112 : index
    %c0_32 = arith.constant 0 : index
    %35 = vector.load %arg8[%c112, %c0_32] : memref<144x384xbf16, #tpu.memory_space<vmem>>, vector<16x384xbf16>
    tpu.vector_store %arg8[%c112, %c0_32], %34 {strides = array<i32>} : memref<144x384xbf16, #tpu.memory_space<vmem>>, vector<16x384xbf16>,
    %c0_33 = arith.constant 0 : index
    %c147 = arith.constant 147 : index
    %36 = vector.load %arg7[%c0_33, %c147] : memref<16x640xbf16, #tpu.memory_space<vmem>>, vector<16x384xbf16>
    %c128_34 = arith.constant 128 : index
    %c0_35 = arith.constant 0 : index
    %37 = vector.load %arg8[%c128_34, %c0_35] : memref<144x384xbf16, #tpu.memory_space<vmem>>, vector<16x384xbf16>
    tpu.vector_store %arg8[%c128_34, %c0_35], %36 {strides = array<i32>} : memref<144x384xbf16, #tpu.memory_space<vmem>>, vector<16x384xbf16>,
    %c0_36 = arith.constant 0 : index
    %c0_37 = arith.constant 0 : index
    %38 = vector.load %arg2[%c0_36, %c0_37] : memref<16x144xbf16, #tpu.memory_space<vmem>>, vector<16x144xbf16>
    %c0_38 = arith.constant 0 : index
    %c0_39 = arith.constant 0 : index
    %39 = vector.load %arg8[%c0_38, %c0_39] : memref<144x384xbf16, #tpu.memory_space<vmem>>, vector<144x384xbf16>
    %cst = arith.constant dense<0.000000e+00> : vector<16x384xf32>
    %40 = tpu.matmul %38, %39, %cst {dimension_numbers = #tpu.dot_dimension_numbers<[1], [0], [0], [1], [0, 0, 1, 1], [], []>} : vector<16x144xbf16>, vector<144x384xbf16>, vector<16x384xf32> -> vector<16x384xf32>
    %41 = vector.broadcast %2 : vector<16x1xf32> to vector<16x384xf32>
    %42 = arith.mulf %40, %41 : vector<16x384xf32>
    %43 = vector.broadcast %3 : vector<16x1xf32> to vector<16x384xf32>
    %44 = arith.addf %42, %43 : vector<16x384xf32>
    %cst_40 = arith.constant 0.000000e+00 : f32
    %45 = vector.broadcast %cst_40 : f32 to vector<16x384xf32>
    %46 = arith.cmpf oge, %44, %45 : vector<16x384xf32>
    %47 = vector.broadcast %4 : vector<16x1xf32> to vector<16x384xf32>
    %48 = arith.mulf %47, %44 : vector<16x384xf32>
    %49 = arith.select %46, %44, %48 : vector<16x384xi1>, vector<16x384xf32>
    %50 = vector.broadcast %8 : vector<1x384xf32> to vector<16x384xf32>
    %51 = arith.mulf %49, %50 : vector<16x384xf32>
    %52 = arith.truncf %51 : vector<16x384xf32> to vector<16x384xbf16>
    %c0_41 = arith.constant 0 : index
    %c128_42 = arith.constant 128 : index
    %53 = vector.load %arg7[%c0_41, %c128_42] : memref<16x640xbf16, #tpu.memory_space<vmem>>, vector<16x384xbf16>
    tpu.vector_store %arg7[%c0_41, %c128_42], %52 {strides = array<i32>} : memref<16x640xbf16, #tpu.memory_space<vmem>>, vector<16x384xbf16>,
    %c0_43 = arith.constant 0 : index
    %c109_44 = arith.constant 109 : index
    %54 = vector.load %arg7[%c0_43, %c109_44] : memref<16x640xbf16, #tpu.memory_space<vmem>>, vector<16x384xbf16>
    %c0_45 = arith.constant 0 : index
    %c0_46 = arith.constant 0 : index
    %55 = vector.load %arg8[%c0_45, %c0_46] : memref<144x384xbf16, #tpu.memory_space<vmem>>, vector<16x384xbf16>
    tpu.vector_store %arg8[%c0_45, %c0_46], %54 {strides = array<i32>} : memref<144x384xbf16, #tpu.memory_space<vmem>>, vector<16x384xbf16>,
    %c0_47 = arith.constant 0 : index
    %c110_48 = arith.constant 110 : index
    %56 = vector.load %arg7[%c0_47, %c110_48] : memref<16x640xbf16, #tpu.memory_space<vmem>>, vector<16x384xbf16>
    %c16_49 = arith.constant 16 : index
    %c0_50 = arith.constant 0 : index
    %57 = vector.load %arg8[%c16_49, %c0_50] : memref<144x384xbf16, #tpu.memory_space<vmem>>, vector<16x384xbf16>
    tpu.vector_store %arg8[%c16_49, %c0_50], %56 {strides = array<i32>} : memref<144x384xbf16, #tpu.memory_space<vmem>>, vector<16x384xbf16>,
    %c0_51 = arith.constant 0 : index
    %c111_52 = arith.constant 111 : index
    %58 = vector.load %arg7[%c0_51, %c111_52] : memref<16x640xbf16, #tpu.memory_space<vmem>>, vector<16x384xbf16>
    %c32_53 = arith.constant 32 : index
    %c0_54 = arith.constant 0 : index
    %59 = vector.load %arg8[%c32_53, %c0_54] : memref<144x384xbf16, #tpu.memory_space<vmem>>, vector<16x384xbf16>
    tpu.vector_store %arg8[%c32_53, %c0_54], %58 {strides = array<i32>} : memref<144x384xbf16, #tpu.memory_space<vmem>>, vector<16x384xbf16>,
    %c0_55 = arith.constant 0 : index
    %c127_56 = arith.constant 127 : index
    %60 = vector.load %arg7[%c0_55, %c127_56] : memref<16x640xbf16, #tpu.memory_space<vmem>>, vector<16x384xbf16>
    %c48_57 = arith.constant 48 : index
    %c0_58 = arith.constant 0 : index
    %61 = vector.load %arg8[%c48_57, %c0_58] : memref<144x384xbf16, #tpu.memory_space<vmem>>, vector<16x384xbf16>
    tpu.vector_store %arg8[%c48_57, %c0_58], %60 {strides = array<i32>} : memref<144x384xbf16, #tpu.memory_space<vmem>>, vector<16x384xbf16>,
    %c0_59 = arith.constant 0 : index
    %c128_60 = arith.constant 128 : index
    %62 = vector.load %arg7[%c0_59, %c128_60] : memref<16x640xbf16, #tpu.memory_space<vmem>>, vector<16x384xbf16>
    %c64_61 = arith.constant 64 : index
    %c0_62 = arith.constant 0 : index
    %63 = vector.load %arg8[%c64_61, %c0_62] : memref<144x384xbf16, #tpu.memory_space<vmem>>, vector<16x384xbf16>
    tpu.vector_store %arg8[%c64_61, %c0_62], %62 {strides = array<i32>} : memref<144x384xbf16, #tpu.memory_space<vmem>>, vector<16x384xbf16>,
    %c0_63 = arith.constant 0 : index
    %c129_64 = arith.constant 129 : index
    %64 = vector.load %arg7[%c0_63, %c129_64] : memref<16x640xbf16, #tpu.memory_space<vmem>>, vector<16x384xbf16>
    %c80_65 = arith.constant 80 : index
    %c0_66 = arith.constant 0 : index
    %65 = vector.load %arg8[%c80_65, %c0_66] : memref<144x384xbf16, #tpu.memory_space<vmem>>, vector<16x384xbf16>
    tpu.vector_store %arg8[%c80_65, %c0_66], %64 {strides = array<i32>} : memref<144x384xbf16, #tpu.memory_space<vmem>>, vector<16x384xbf16>,
    %c0_67 = arith.constant 0 : index
    %c145_68 = arith.constant 145 : index
    %66 = vector.load %arg7[%c0_67, %c145_68] : memref<16x640xbf16, #tpu.memory_space<vmem>>, vector<16x384xbf16>
    %c96_69 = arith.constant 96 : index
    %c0_70 = arith.constant 0 : index
    %67 = vector.load %arg8[%c96_69, %c0_70] : memref<144x384xbf16, #tpu.memory_space<vmem>>, vector<16x384xbf16>
    tpu.vector_store %arg8[%c96_69, %c0_70], %66 {strides = array<i32>} : memref<144x384xbf16, #tpu.memory_space<vmem>>, vector<16x384xbf16>,
    %c0_71 = arith.constant 0 : index
    %c146_72 = arith.constant 146 : index
    %68 = vector.load %arg7[%c0_71, %c146_72] : memref<16x640xbf16, #tpu.memory_space<vmem>>, vector<16x384xbf16>
    %c112_73 = arith.constant 112 : index
    %c0_74 = arith.constant 0 : index
    %69 = vector.load %arg8[%c112_73, %c0_74] : memref<144x384xbf16, #tpu.memory_space<vmem>>, vector<16x384xbf16>
    tpu.vector_store %arg8[%c112_73, %c0_74], %68 {strides = array<i32>} : memref<144x384xbf16, #tpu.memory_space<vmem>>, vector<16x384xbf16>,
    %c0_75 = arith.constant 0 : index
    %c147_76 = arith.constant 147 : index
    %70 = vector.load %arg7[%c0_75, %c147_76] : memref<16x640xbf16, #tpu.memory_space<vmem>>, vector<16x384xbf16>
    %c128_77 = arith.constant 128 : index
    %c0_78 = arith.constant 0 : index
    %71 = vector.load %arg8[%c128_77, %c0_78] : memref<144x384xbf16, #tpu.memory_space<vmem>>, vector<16x384xbf16>
    tpu.vector_store %arg8[%c128_77, %c0_78], %70 {strides = array<i32>} : memref<144x384xbf16, #tpu.memory_space<vmem>>, vector<16x384xbf16>,
    %c0_79 = arith.constant 0 : index
    %c0_80 = arith.constant 0 : index
    %72 = vector.load %arg3[%c0_79, %c0_80] : memref<16x144xbf16, #tpu.memory_space<vmem>>, vector<16x144xbf16>
    %c0_81 = arith.constant 0 : index
    %c0_82 = arith.constant 0 : index
    %73 = vector.load %arg8[%c0_81, %c0_82] : memref<144x384xbf16, #tpu.memory_space<vmem>>, vector<144x384xbf16>
    %cst_83 = arith.constant dense<0.000000e+00> : vector<16x384xf32>
    %74 = tpu.matmul %72, %73, %cst_83 {dimension_numbers = #tpu.dot_dimension_numbers<[1], [0], [0], [1], [0, 0, 1, 1], [], []>} : vector<16x144xbf16>, vector<144x384xbf16>, vector<16x384xf32> -> vector<16x384xf32>
    %c0_84 = arith.constant 0 : index
    %c0_85 = arith.constant 0 : index
    %c128_86 = arith.constant 128 : index
    %75 = vector.load %arg1[%c0_84, %c0_85, %c128_86] : memref<1x16x640xbf16, #tpu.memory_space<vmem>>, vector<1x16x384xbf16>
    %76 = vector.shape_cast %75 : vector<1x16x384xbf16> to vector<16x384xbf16>
    %77 = arith.extf %76 : vector<16x384xbf16> to vector<16x384xf32>
    %78 = vector.broadcast %5 : vector<16x1xf32> to vector<16x384xf32>
    %79 = arith.mulf %74, %78 : vector<16x384xf32>
    %80 = vector.broadcast %6 : vector<16x1xf32> to vector<16x384xf32>
    %81 = arith.addf %79, %80 : vector<16x384xf32>
    %82 = arith.addf %81, %77 : vector<16x384xf32>
    %83 = vector.broadcast %8 : vector<1x384xf32> to vector<16x384xf32>
    %84 = arith.mulf %82, %83 : vector<16x384xf32>
    %cst_87 = arith.constant 0.000000e+00 : bf16
    %85 = vector.broadcast %cst_87 : bf16 to vector<16x128xbf16>
    %c0_88 = arith.constant 0 : index
    %c0_89 = arith.constant 0 : index
    %c0_90 = arith.constant 0 : index
    %86 = vector.load %arg6[%c0_88, %c0_89, %c0_90] : memref<1x16x640xbf16, #tpu.memory_space<vmem>>, vector<1x16x128xbf16>
    %87 = vector.shape_cast %86 : vector<1x16x128xbf16> to vector<16x128xbf16>
    %88 = vector.shape_cast %85 : vector<16x128xbf16> to vector<1x16x128xbf16>
    tpu.vector_store %arg6[%c0_88, %c0_89, %c0_90], %88 {strides = array<i32>} : memref<1x16x640xbf16, #tpu.memory_space<vmem>>, vector<1x16x128xbf16>,
    %cst_91 = arith.constant 0.000000e+00 : bf16
    %89 = vector.broadcast %cst_91 : bf16 to vector<16x128xbf16>
    %c0_92 = arith.constant 0 : index
    %c0_93 = arith.constant 0 : index
    %c512 = arith.constant 512 : index
    %90 = vector.load %arg6[%c0_92, %c0_93, %c512] : memref<1x16x640xbf16, #tpu.memory_space<vmem>>, vector<1x16x128xbf16>
    %91 = vector.shape_cast %90 : vector<1x16x128xbf16> to vector<16x128xbf16>
    %92 = vector.shape_cast %89 : vector<16x128xbf16> to vector<1x16x128xbf16>
    tpu.vector_store %arg6[%c0_92, %c0_93, %c512], %92 {strides = array<i32>} : memref<1x16x640xbf16, #tpu.memory_space<vmem>>, vector<1x16x128xbf16>,
    %93 = arith.truncf %84 : vector<16x384xf32> to vector<16x384xbf16>
    %c0_94 = arith.constant 0 : index
    %c0_95 = arith.constant 0 : index
    %c128_96 = arith.constant 128 : index
    %94 = vector.load %arg6[%c0_94, %c0_95, %c128_96] : memref<1x16x640xbf16, #tpu.memory_space<vmem>>, vector<1x16x384xbf16>
    %95 = vector.shape_cast %94 : vector<1x16x384xbf16> to vector<16x384xbf16>
    %96 = vector.shape_cast %93 : vector<16x384xbf16> to vector<1x16x384xbf16>
    tpu.vector_store %arg6[%c0_94, %c0_95, %c128_96], %96 {strides = array<i32>} : memref<1x16x640xbf16, #tpu.memory_space<vmem>>, vector<1x16x384xbf16>,
    return
  }
  func.func @transform_0(%arg0: i32) -> (i32, i32, i32) {
    %c0_i32 = arith.constant 0 : i32
    %c0_i32_0 = arith.constant 0 : i32
    %c0_i32_1 = arith.constant 0 : i32
    return %arg0, %c0_i32, %c0_i32_0 : i32, i32, i32
  }
  func.func @transform_1(%arg0: i32) -> (i32, i32) {
    %c0_i32 = arith.constant 0 : i32
    %c0_i32_0 = arith.constant 0 : i32
    %c0_i32_1 = arith.constant 0 : i32
    return %c0_i32, %c0_i32_0 : i32, i32
  }
  func.func @transform_2(%arg0: i32) -> (i32, i32) {
    %c0_i32 = arith.constant 0 : i32
    %c0_i32_0 = arith.constant 0 : i32
    %c0_i32_1 = arith.constant 0 : i32
    return %c0_i32, %c0_i32_0 : i32, i32
  }
  func.func @transform_3(%arg0: i32) -> (i32, i32) {
    %c0_i32 = arith.constant 0 : i32
    %c0_i32_0 = arith.constant 0 : i32
    %c0_i32_1 = arith.constant 0 : i32
    return %c0_i32, %c0_i32_0 : i32, i32
  }
  func.func @transform_4(%arg0: i32) -> (i32, i32) {
    %c0_i32 = arith.constant 0 : i32
    %c0_i32_0 = arith.constant 0 : i32
    %c0_i32_1 = arith.constant 0 : i32
    return %c0_i32, %c0_i32_0 : i32, i32
  }
  func.func @transform_5(%arg0: i32) -> (i32, i32, i32) {
    %c0_i32 = arith.constant 0 : i32
    %c0_i32_0 = arith.constant 0 : i32
    %c0_i32_1 = arith.constant 0 : i32
    return %arg0, %c0_i32, %c0_i32_0 : i32, i32, i32
  }
}

</mosaic_0001>

<bundles_post_ra>
// kernel: ibasic_block_forward.1
= control target key start
LH: loop header
LB: loop body
LE: loop exit
PB: predicated region body
PF: predicated region fallthrough
CT: control target
= control target key end

     0   :  { %s2031_s18 = smov 0   ;;  %s2397_s0 = inlined_call_operand.vmem [shape: bf16[2,16,640], index: 0, kind: input, shape index: {}]   ;;  %s2398_s1 = inlined_call_operand.vmem [shape: bf16[16,144], index: 1, kind: input, shape index: {}]   ;;  %s2399_s2 = inlined_call_operand.vmem [shape: bf16[16,144], index: 2, kind: input, shape index: {}]   ;;  %s2400_s3 = inlined_call_operand.vmem [shape: f32[16,8], index: 3, kind: input, shape index: {}]   ;;  %s2401_s4 = inlined_call_operand.vmem [shape: f32[1,640], index: 4, kind: input, shape index: {}]   ;;  %s2402_s5 = inlined_call_operand.vmem [shape: bf16[2,16,640], index: 5, kind: output, shape index: {}]  }
   0x1 LB: > { %s1635_s19 = sadd.s32 4294967295, %s1984_s18   ;;  %p1639_p0 = scmp.ge.s32.totalorder %s1984_s18, 1  ;;  %s1984_s18 = sphi %s2031_s18, %s15_s18  }
   0x2   : > { %p187_p1 = scmp.lt.s32.totalorder %s1984_s18, 3 }
   0x4   : > { %p188_p2 = pnand %p1639_p0, %p187_p1 }
   0x5   : > { %p215_p3 = scmp.lt.s32.totalorder (!%p188_p2), %s1635_s19, 1  ;;  %s1988_s8 = smov (!%p188_p2), 110  }
   0x6   : > { %191 = sbr.rel (%p188_p2) target bundleno = 878 (0x36e), region = 40  ;;  %s1989_s9 = smov (!%p188_p2), 111  }
   0x7   : > { %s1990_s10 = smov (!%p188_p2), 127   ;;  %s1991_s11 = smov (!%p188_p2), 109  }
   0x8   : > { %s1992_s12 = smov (!%p188_p2), 1   ;;  %s1993_s13 = smov (!%p188_p2), 17  }
   0x9   : > { %s1994_s14 = smov (!%p188_p2), 18   ;;  %s1995_s15 = smov (!%p188_p2), 19  }
   0xb   : > { %v2042_v0 = vld [vmem:[%s2400_s3] sm:$0xff]  ;;  %v1986_v1 = vmov 1   ;;  %v1987_v2 = vmov 0   ;;  %s2404_s19 = smov (!%p215_p3, %s1635_s19), 1  ;;  %v2055_v3 = vld [vmem:[%s2400_s3 + $0x8] sm:$0xff]  ;;  %vm337_vm0 = vcmask 1043456  }
   0xc   : > { %1965 = vset.pattern.permute.xlu1 %v1986_v1  ;;  %1964 = vset.pattern.permute.xlu0 %v1987_v2  ;;  %s1940_s22 = smul.u32 40, %s2404_s19  ;;  %v228_v7 = vld [vmem:[%s2401_s4] sm:$0x1f]  ;;  %vm557_vm1 = vcmask 900096   ;;  %vm522_vm2 = vcmask 908288   ;;  %vm592_vm3 = vcmask 891904  }
   0xd   : > { %267 = vperm.xlu1 %1965, %v2042_v0   ;;  %248 = vperm.xlu0 %1964, %v2042_v0   ;;  %v285_v15 = vperm.slane %v228_v7, 0  ;;  %v286_v16 = vperm.slane %v228_v7, 1  ;;  %v287_v17 = vperm.slane %v228_v7, 2  ;;  %v288_v18 = vperm.slane %v228_v7, 3 }
   0xe   : > { %s2049_s25 = scalar_lea.vmem %s2402_s5, %s1940_s22  ;;  %s2065_s30 = scalar_lea.vmem %s2397_s0, %s1940_s22  ;;  %v289_v25 = vperm.slane %v228_v7, 4  ;;  %vm487_vm4 = vcmask 1039360   ;;  %vm444_vm5 = vcmask 7168   ;;  %vm374_vm6 = vcmask 146432  }
   0xf   : > { %1568 = vst [vmem:[%s2049_s25] sm:$0xf] %v1987_v2  ;;  %v230_v4 = vld [vmem:[%s2065_s30] sm:$0xff]  ;;  %v231_v5 = vld [vmem:[%s2065_s30 + $0x8] sm:$0xff]  ;;  %v232_v6 = vld [vmem:[%s2065_s30 + $0x10] sm:$0xf]  ;;  %vm797_vm7 = vcmask 130048  }
  0x10   : > { %1569 = vst [vmem:[%s2049_s25 + $0x14] sm:$0xf] %v1987_v2  ;;  %v236_v8 = vunpack.c.l.bf16 %v230_v4  ;;  %v237_v9 = vunpack.c.h.bf16 %v230_v4  ;;  %v238_v10 = vunpack.c.l.bf16 %v231_v5  ;;  %v239_v11 = vunpack.c.h.bf16 %v231_v5  ;;  %v233_v13 = vld [vmem:[%s2065_s30 + $0x14] sm:$0xff]  ;;  %v234_v24 = vld [vmem:[%s2065_s30 + $0x1c] sm:$0xff]  ;;  %v235_v32 = vld [vmem:[%s2065_s30 + $0x24] sm:$0xf] }
  0x11   : > { %1570 = vst [vmem:[%s2049_s25 + $0x10] sm:$0xf] %v1987_v2  ;;  %v240_v12 = vunpack.c.l.bf16 %v232_v6  ;;  %v241_v27 = vunpack.c.l.bf16 %v233_v13  ;;  %v242_v34 = vunpack.c.h.bf16 %v233_v13  ;;  %v243_v35 = vunpack.c.l.bf16 %v234_v24 }
  0x12   : > { %1571 = vst [vmem:[%s2049_s25 + $0x24] sm:$0xf] %v1987_v2  ;;  %v244_v36 = vunpack.c.h.bf16 %v234_v24  ;;  %v245_v42 = vunpack.c.l.bf16 %v235_v32  ;;  %vm409_vm8 = vcmask 138240   ;;  %vm339_vm9 = vcmask 154624  }
  0x15   : > { %271 = vperm.xlu1 %1965, %v2055_v3   ;;  %253 = vperm.xlu0 %1964, %v2055_v3  }
  0x7f   : > { %v268_v14 = vpop.permute.xlu1 %267  ;;  %v249_v19 = vpop.permute.xlu0 %248 }
  0x80   : > { %v256_v20 = vmul.f32 %v249_v19, %v236_v8  ;;  %v257_v21 = vmul.f32 %v249_v19, %v237_v9  ;;  %v258_v22 = vmul.f32 %v249_v19, %v238_v10  ;;  %v259_v23 = vmul.f32 %v249_v19, %v239_v11 }
  0x81   : > { %v260_v26 = vmul.f32 %v249_v19, %v240_v12 }
  0x82   : > { %v274_v28 = vadd.f32 %v268_v14, %v256_v20  ;;  %v275_v29 = vadd.f32 %v268_v14, %v257_v21  ;;  %v276_v30 = vadd.f32 %v268_v14, %v258_v22  ;;  %v277_v31 = vadd.f32 %v268_v14, %v259_v23 }
  0x83   : > { %v278_v33 = vadd.f32 %v268_v14, %v260_v26 }
  0x84   : > { %v295_v37 = vmul.f32 %v285_v15, %v274_v28  ;;  %v296_v38 = vmul.f32 %v286_v16, %v275_v29  ;;  %v297_v39 = vmul.f32 %v287_v17, %v276_v30  ;;  %v298_v40 = vmul.f32 %v288_v18, %v277_v31 }
  0x85   : > { %v299_v41 = vmul.f32 %v289_v25, %v278_v33 }
  0x86   : > { %v2076_v43 = vpack.c.bf16 %v296_v38, %v295_v37  ;;  %v2078_v44 = vpack.c.bf16 %v298_v40, %v297_v39 }
  0x87   : > { %v307_v45 = vpack.c.bf16 %v299_v41, %v299_v41  ;;  %v254_v46 = vpop.permute.xlu0 %253  ;;  %v272_v51 = vpop.permute.xlu1 %271 }
  0x88   : > { %311 = vst [vmem:[#allocation2] sm:$0xff] %v2076_v43  ;;  %v261_v47 = vmul.f32 %v254_v46, %v241_v27  ;;  %v262_v48 = vmul.f32 %v254_v46, %v242_v34  ;;  %v263_v49 = vmul.f32 %v254_v46, %v243_v35  ;;  %v264_v50 = vmul.f32 %v254_v46, %v244_v36 }
  0x89   : > { %312 = vst [vmem:[#allocation2 + $0x8] sm:$0xff] %v2078_v44  ;;  %v265_v52 = vmul.f32 %v254_v46, %v245_v42 }
  0x8a   : > { %313 = vst [vmem:[#allocation2 + $0x10] sm:$0xf] %v307_v45  ;;  %v279_v53 = vadd.f32 %v272_v51, %v261_v47  ;;  %v280_v54 = vadd.f32 %v272_v51, %v262_v48  ;;  %v281_v55 = vadd.f32 %v272_v51, %v263_v49  ;;  %v282_v56 = vadd.f32 %v272_v51, %v264_v50 }
  0x8b   : > { %v283_v57 = vadd.f32 %v272_v51, %v265_v52 }
  0x8c   : > { %v300_v58 = vmul.f32 %v285_v15, %v279_v53  ;;  %v301_v59 = vmul.f32 %v286_v16, %v280_v54  ;;  %v302_v60 = vmul.f32 %v287_v17, %v281_v55  ;;  %v303_v61 = vmul.f32 %v288_v18, %v282_v56 }
  0x8d   : > { %v304_v62 = vmul.f32 %v289_v25, %v283_v57 }
  0x8e   : > { %v308_v63 = vpack.c.bf16 %v301_v59, %v300_v58  ;;  %v309_v1 = vpack.c.bf16 %v303_v61, %v302_v60 }
  0x8f   : > { %v310_v2 = vpack.c.bf16 %v304_v62, %v304_v62 }
  0x90   : > { %314 = vst [vmem:[#allocation2 + $0x14] sm:$0xff] %v308_v63  ;;  %v536_v4 = vld [vmem:[#allocation2 + $0x4] sm:$0xff]  ;;  %v459_v5 = vld [vmem:[#allocation2 + $0xc] sm:$0xf] }
  0x91   : > { %315 = vst [vmem:[#allocation2 + $0x1c] sm:$0xff] %v309_v1  ;;  %544 = vrot.lane.b32.xlu2 %v536_v4, %s1988_s8  ;;  %v537_v7 = vld [vmem:[#allocation2 + $0xc] sm:$0xff] }
  0x92   : > { %316 = vst [vmem:[#allocation2 + $0x24] sm:$0xf] %v310_v2 }
  0x93   : > { %462 = vst [vmem:[#allocation3 + $0x60] sm:$0xff] %v536_v4 }
  0x94   : > { %463 = vst [vmem:[#allocation3 + $0x68] sm:$0xf] %v459_v5 }
  0x98   : > { %v538_v6 = vld [vmem:[#allocation2 + $0x18] sm:$0xff]  ;;  %v461_v8 = vld [vmem:[#allocation2 + $0x20] sm:$0xf] }
  0x99   : > { %v539_v9 = vld [vmem:[#allocation2 + $0x20] sm:$0xff]  ;;  %548 = vrot.lane.b32.xlu0 %v538_v6, %s1988_s8  ;;  %546 = vrot.lane.b32.xlu2 %v537_v7, %s1988_s8  ;;  %464 = vst [vmem:[#allocation3 + $0x6c] sm:$0xff] %v538_v6 }
  0x9a   : > { %550 = vrot.lane.b32.xlu1 %v539_v9, %s1988_s8  ;;  %465 = vst [vmem:[#allocation3 + $0x74] sm:$0xf] %v461_v8 }
  0xa1   : > { %511 = vrot.lane.b32.xlu0 %v537_v7, %s1989_s9  ;;  %509 = vrot.lane.b32.xlu2 %v536_v4, %s1989_s9 }
  0xa2   : > { %513 = vrot.lane.b32.xlu1 %v538_v6, %s1989_s9 }
  0xa9   : > { %515 = vrot.lane.b32.xlu2 %v539_v9, %s1989_s9  ;;  %474 = vrot.lane.b32.xlu0 %v536_v4, %s1990_s10 }
  0xaa   : > { %476 = vrot.lane.b32.xlu1 %v537_v7, %s1990_s10 }
  0xb1   : > { %478 = vrot.lane.b32.xlu2 %v538_v6, %s1990_s10  ;;  %480 = vrot.lane.b32.xlu0 %v539_v9, %s1990_s10 }
  0xb2   : > { %579 = vrot.lane.b32.xlu1 %v536_v4, %s1991_s11 }
  0xb9   : > { %581 = vrot.lane.b32.xlu2 %v537_v7, %s1991_s11  ;;  %583 = vrot.lane.b32.xlu0 %v538_v6, %s1991_s11 }
  0xba   : > { %585 = vrot.lane.b32.xlu1 %v539_v9, %s1991_s11 }
  0xc1   : > { %433 = vrot.lane.b32.xlu0 %v2078_v44, %s1992_s12  ;;  %431 = vrot.lane.b32.xlu2 %v2076_v43, %s1992_s12 }
  0xc2   : > { %435 = vrot.lane.b32.xlu1 %v308_v63, %s1992_s12 }
  0xc9   : > { %437 = vrot.lane.b32.xlu2 %v309_v1, %s1992_s12  ;;  %396 = vrot.lane.b32.xlu0 %v2076_v43, %s1993_s13 }
  0xca   : > { %398 = vrot.lane.b32.xlu1 %v2078_v44, %s1993_s13 }
  0xd1   : > { %400 = vrot.lane.b32.xlu2 %v308_v63, %s1993_s13  ;;  %402 = vrot.lane.b32.xlu0 %v309_v1, %s1993_s13 }
  0xd2   : > { %361 = vrot.lane.b32.xlu1 %v2076_v43, %s1994_s14 }
  0xd9   : > { %363 = vrot.lane.b32.xlu2 %v2078_v44, %s1994_s14  ;;  %365 = vrot.lane.b32.xlu0 %v308_v63, %s1994_s14 }
  0xda   : > { %367 = vrot.lane.b32.xlu1 %v309_v1, %s1994_s14 }
  0xe1   : > { %327 = vrot.lane.b32.xlu0 %v2078_v44, %s1995_s15  ;;  %325 = vrot.lane.b32.xlu2 %v2076_v43, %s1995_s15 }
  0xe2   : > { %329 = vrot.lane.b32.xlu1 %v308_v63, %s1995_s15 }
  0xe9   : > { %331 = vrot.lane.b32.xlu2 %v309_v1, %s1995_s15 }
  0xeb   : > { %v545_v10 = vpop.permute.xlu2 %544 }
  0xec   : > { %v552_v12 = vrot.slane %v545_v10, 4 }
  0xf3   : > { %v547_v11 = vpop.permute.xlu2 %546 }
  0xf4   : > { %v553_v13 = vrot.slane %v547_v11, 4 }
  0xf6   : > { %v556_v14 = vsel %vm337_vm0, %v552_v12, %v553_v13  ;;  %v559_v15 = vsel %vm557_vm1, %v547_v11, %v553_v13 }
  0xf7   : > { %v558_v16 = vsel %vm557_vm1, %v545_v10, %v556_v14  ;;  %568 = vst [vmem:[#allocation3 + $0xb0] sm:$0xf] %v559_v15 }
  0xf8   : > { %567 = vst [vmem:[#allocation3 + $0xa8] sm:$0xff] %v558_v16 }
  0xfb   : > { %v510_v17 = vpop.permute.xlu2 %509 }
  0xfc   : > { %v517_v31 = vrot.slane %v510_v17, 4 }
  0xff   : > { %v1736_v41 = vld [vmem:[#allocation3 + $0xa8] sm:$0xf]  ;;  %v1905_v42 = vld [vmem:[#allocation3 + $0xac] sm:$0xf] }
 0x103   : > { %v516_v18 = vpop.permute.xlu2 %515 }
 0x104   : > { %v520_v19 = vrot.slane %v516_v18, 4 }
 0x106   : > { %v527_v20 = vsel %vm522_vm2, %v516_v18, %v520_v19 }
 0x107   : > { %535 = vst [vmem:[#allocation3 + $0xa4] sm:$0xf] %v527_v20 }
 0x10b   : > { %v549_v21 = vpop.permute.xlu0 %548  ;;  %v2126_v22 = vpop.permute.xlu2 %478 }
 0x10c   : > { %v551_v23 = vpop.permute.xlu1 %550  ;;  %v554_v24 = vrot.slane %v549_v21, 4  ;;  %v484_v1 = vrot.slane %v2126_v22, 4 }
 0x10d   : > { %v555_v25 = vrot.slane %v551_v23, 4 }
 0x10f   : > { %v562_v26 = vsel %vm557_vm1, %v551_v23, %v555_v25  ;;  %v560_v27 = vsel %vm337_vm0, %v554_v24, %v555_v25 }
 0x110   : > { %570 = vst [vmem:[#allocation3 + $0xbc] sm:$0xf] %v562_v26  ;;  %v561_v28 = vsel %vm557_vm1, %v549_v21, %v560_v27  ;;  %v1897_v27 = vld [vmem:[#allocation3 + $0x68] sm:$0xf0] }
 0x111   : > { %569 = vst [vmem:[#allocation3 + $0xb4] sm:$0xff] %v561_v28  ;;  %v1702_v28 = vld [vmem:[#allocation3 + $0x6c] sm:$0xf0] }
 0x113   : > { %v512_v29 = vpop.permute.xlu0 %511  ;;  %v582_v30 = vpop.permute.xlu2 %581 }
 0x114   : > { %v514_v32 = vpop.permute.xlu1 %513  ;;  %v518_v33 = vrot.slane %v512_v29, 4  ;;  %v588_v34 = vrot.slane %v582_v30, 4 }
 0x115   : > { %v519_v35 = vrot.slane %v514_v32, 4 }
 0x116   : > { %v521_v36 = vsel %vm337_vm0, %v517_v31, %v518_v33  ;;  %v524_v37 = vsel %vm522_vm2, %v512_v29, %v518_v33  ;;  %v594_v40 = vsel %vm592_vm3, %v582_v30, %v588_v34  ;;  %v1700_v29 = vld [vmem:[#allocation3 + $0x60] sm:$0xf]  ;;  %v1896_v30 = vld [vmem:[#allocation3 + $0x64] sm:$0xf] }
 0x117   : > { %v525_v38 = vsel %vm337_vm0, %v519_v35, %v520_v19  ;;  %v523_v39 = vsel %vm522_vm2, %v510_v17, %v521_v36  ;;  %533 = vst [vmem:[#allocation3 + $0x98] sm:$0xf] %v524_v37  ;;  %v1701_v33 = vor.u32 %v1897_v27, %v1700_v29 }
 0x118   : > { %v526_v43 = vsel %vm522_vm2, %v514_v32, %v525_v38  ;;  %532 = vst [vmem:[#allocation3 + $0x90] sm:$0xff] %v523_v39  ;;  %v1906_v44 = vld [vmem:[#allocation3 + $0xb0] sm:$0xf0]  ;;  %v1738_v45 = vld [vmem:[#allocation3 + $0xb4] sm:$0xf0] }
 0x119   : > { %534 = vst [vmem:[#allocation3 + $0x9c] sm:$0xff] %v526_v43  ;;  %v1737_v46 = vor.u32 %v1906_v44, %v1736_v41  ;;  %v1741_v47 = vor.u32 %v1905_v42, %v1738_v45  ;;  %v1882_v44 = vld [vmem:[%s2398_s1 + $0x4] sm:$0xf]  ;;  %v1646_v45 = vld [vmem:[%s2398_s1 + $0x8] sm:$0xf0] }
 0x11a   : > { %603 = vst [vmem:[#allocation3 + $0xc8] sm:$0xf] %v594_v40  ;;  %v1907_v40 = vld [vmem:[#allocation3 + $0xb8] sm:$0xf0] }
 0x11b   : > { %801 = vmatpush.bf16.msra.mxu0 %v1737_v46  ;;  %829 = vmatpush.bf16.msra.mxu2 %v1741_v47  ;;  %v475_v48 = vpop.permute.xlu0 %474  ;;  %v2137_v49 = vpop.permute.xlu2 %431 }
 0x11c   : > { %v477_v50 = vpop.permute.xlu1 %476  ;;  %v482_v51 = vrot.slane %v475_v48, 4  ;;  %v439_v35 = vrot.slane %v2137_v49, 4 }
 0x11d   : > { %v483_v52 = vrot.slane %v477_v50, 4 }
 0x11f   : > { %v489_v53 = vsel %vm487_vm4, %v477_v50, %v483_v52  ;;  %v486_v54 = vsel %vm337_vm0, %v482_v51, %v483_v52  ;;  %v1724_v55 = vld [vmem:[#allocation3 + $0x90] sm:$0xf]  ;;  %v1902_v56 = vld [vmem:[#allocation3 + $0x94] sm:$0xf] }
 0x120   : > { %498 = vst [vmem:[#allocation3 + $0x80] sm:$0xf] %v489_v53  ;;  %v488_v57 = vsel %vm487_vm4, %v475_v48, %v486_v54  ;;  %v1903_v58 = vld [vmem:[#allocation3 + $0x98] sm:$0xf0]  ;;  %v1726_v59 = vld [vmem:[#allocation3 + $0x9c] sm:$0xf0] }
 0x121   : > { %497 = vst [vmem:[#allocation3 + $0x78] sm:$0xff] %v488_v57  ;;  %v1725_v60 = vor.u32 %v1903_v58, %v1724_v55  ;;  %v1729_v61 = vor.u32 %v1902_v56, %v1726_v59  ;;  %v1744_v57 = vld [vmem:[#allocation3 + $0xb0] sm:$0xf]  ;;  %v1756_v58 = vld [vmem:[#allocation3 + $0xc8] sm:$0xf] }
 0x123   : > { %802 = vmatpush.bf16.msra.mxu0 %v1725_v60  ;;  %830 = vmatpush.bf16.msra.mxu2 %v1729_v61  ;;  %v481_v62 = vpop.permute.xlu0 %480  ;;  %v438_v63 = vpop.permute.xlu2 %437  ;;  %v2175_v60 = vor.u32 %v1882_v44, %v1646_v45 }
 0x124   : > { %v580_v2 = vpop.permute.xlu1 %579  ;;  %v485_v4 = vrot.slane %v481_v62, 4  ;;  %v442_v5 = vrot.slane %v438_v63, 4 }
 0x125   : > { %v587_v6 = vrot.slane %v580_v2, 4 }
 0x126   : > { %v490_v7 = vsel %vm337_vm0, %v484_v1, %v485_v4  ;;  %v492_v8 = vsel %vm487_vm4, %v481_v62, %v485_v4  ;;  %v449_v11 = vsel %vm444_vm5, %v438_v63, %v442_v5  ;;  %v1732_v63 = vld [vmem:[#allocation3 + $0x98] sm:$0xf] }
 0x127   : > { %v591_v9 = vsel %vm337_vm0, %v587_v6, %v588_v34  ;;  %v491_v10 = vsel %vm487_vm4, %v2126_v22, %v490_v7  ;;  %500 = vst [vmem:[#allocation3 + $0x8c] sm:$0xf] %v492_v8  ;;  %v1705_v34 = vor.u32 %v1896_v30, %v1702_v28  ;;  %v1708_v28 = vld [vmem:[#allocation3 + $0x68] sm:$0xf] }
 0x128   : > { %v593_v12 = vsel %vm592_vm3, %v580_v2, %v591_v9  ;;  %499 = vst [vmem:[#allocation3 + $0x84] sm:$0xff] %v491_v10  ;;  %v1712_v18 = vld [vmem:[#allocation3 + $0x78] sm:$0xf]  ;;  %v1899_v22 = vld [vmem:[#allocation3 + $0x7c] sm:$0xf] }
 0x129   : > { %602 = vst [vmem:[#allocation3 + $0xc0] sm:$0xff] %v593_v12 }
 0x12a   : > { %457 = vst [vmem:[#allocation3 + $0x5c] sm:$0xf] %v449_v11 }
 0x12b   : > { %v584_v13 = vpop.permute.xlu0 %583  ;;  %v2150_v14 = vpop.permute.xlu2 %400 }
 0x12c   : > { %v586_v15 = vpop.permute.xlu1 %585  ;;  %v589_v16 = vrot.slane %v584_v13, 4 }
 0x12d   : > { %v590_v17 = vrot.slane %v586_v15, 4 }
 0x12e   : > { %v1901_v11 = vld [vmem:[#allocation3 + $0x88] sm:$0xf0] }
 0x12f   : > { %v597_v19 = vsel %vm592_vm3, %v586_v15, %v590_v17  ;;  %v595_v20 = vsel %vm337_vm0, %v589_v16, %v590_v17  ;;  %v1900_v21 = vld [vmem:[#allocation3 + $0x80] sm:$0xf0]  ;;  %v1714_v23 = vld [vmem:[#allocation3 + $0x84] sm:$0xf0] }
 0x130   : > { %605 = vst [vmem:[#allocation3 + $0xd4] sm:$0xf] %v597_v19  ;;  %v596_v24 = vsel %vm592_vm3, %v584_v13, %v595_v20  ;;  %v1713_v25 = vor.u32 %v1900_v21, %v1712_v18  ;;  %v1717_v26 = vor.u32 %v1899_v22, %v1714_v23  ;;  %v1748_v43 = vld [vmem:[#allocation3 + $0xc0] sm:$0xf]  ;;  %v1908_v50 = vld [vmem:[#allocation3 + $0xc4] sm:$0xf] }
 0x131   : > { %604 = vst [vmem:[#allocation3 + $0xcc] sm:$0xff] %v596_v24  ;;  %v1720_v18 = vld [vmem:[#allocation3 + $0x80] sm:$0xf]  ;;  %v1898_v22 = vld [vmem:[#allocation3 + $0x70] sm:$0xf0]  ;;  %v406_v23 = vrot.slane %v2150_v14, 4 }
 0x132   : > { %803 = vmatpush.bf16.msra.mxu0 %v1713_v25  ;;  %831 = vmatpush.bf16.msra.mxu2 %v1717_v26  ;;  %v1721_v19 = vor.u32 %v1901_v11, %v1720_v18 }
 0x133   : > { %v434_v31 = vpop.permute.xlu0 %433  ;;  %v2155_v32 = vpop.permute.xlu2 %363 }
 0x134   : > { %v436_v36 = vpop.permute.xlu1 %435  ;;  %v440_v37 = vrot.slane %v434_v31, 4  ;;  %v370_v38 = vrot.slane %v2155_v32, 4 }
 0x135   : > { %v441_v39 = vrot.slane %v436_v36, 4 }
 0x136   : > { %v443_v41 = vsel %vm337_vm0, %v439_v35, %v440_v37  ;;  %v446_v42 = vsel %vm444_vm5, %v434_v31, %v440_v37  ;;  %804 = vmatpush.bf16.msra.mxu0 %v1701_v33  ;;  %832 = vmatpush.bf16.msra.mxu2 %v1705_v34  ;;  %v376_v48 = vsel %vm374_vm6, %v2155_v32, %v370_v38  ;;  %v1996_v37 = vmov 2  }
 0x137   : > { %v447_v46 = vsel %vm337_vm0, %v441_v39, %v442_v5  ;;  %v445_v47 = vsel %vm444_vm5, %v2137_v49, %v443_v41  ;;  %455 = vst [vmem:[#allocation3 + $0x50] sm:$0xf] %v446_v42  ;;  %v1910_v51 = vld [vmem:[#allocation3 + $0xd0] sm:$0xf0]  ;;  %v1745_v49 = vor.u32 %v1907_v40, %v1744_v57  ;;  %v1904_v5 = vld [vmem:[#allocation3 + $0xa0] sm:$0xf0]  ;;  %v1709_v31 = vor.u32 %v1898_v22, %v1708_v28 }
 0x138   : > { %v448_v52 = vsel %vm444_vm5, %v436_v36, %v447_v46  ;;  %454 = vst [vmem:[#allocation3 + $0x48] sm:$0xff] %v445_v47  ;;  %v1909_v53 = vld [vmem:[#allocation3 + $0xc8] sm:$0xf0]  ;;  %v1750_v54 = vld [vmem:[#allocation3 + $0xcc] sm:$0xf0]  ;;  %v1757_v59 = vor.u32 %v1910_v51, %v1756_v58  ;;  %v1733_v6 = vor.u32 %v1904_v5, %v1732_v63  ;;  %1966 = vset.pattern.permute.xlu0 %v1996_v37  ;;  %v1997_v32 = vmov 3  }
 0x139   : > { %456 = vst [vmem:[#allocation3 + $0x54] sm:$0xff] %v448_v52  ;;  %v1749_v55 = vor.u32 %v1909_v53, %v1748_v43  ;;  %v1753_v56 = vor.u32 %v1908_v50, %v1750_v54  ;;  %1967 = vset.pattern.permute.xlu1 %v1996_v37  ;;  %886 = vperm.xlu0 %1966, %v2042_v0   ;;  %v1998_v57 = vmov 4  }
 0x13a   : > { %385 = vst [vmem:[#allocation3 + $0x20] sm:$0xf] %v376_v48  ;;  %890 = vperm.xlu1 %1967, %v2055_v3   ;;  %1968 = vset.pattern.permute.xlu2 %v1997_v32 }
 0x13b   : > { %822 = vmatpush.bf16.msra.mxu1 %v1749_v55  ;;  %850 = vmatpush.bf16.msra.mxu3 %v1753_v56  ;;  %v397_v61 = vpop.permute.xlu0 %396  ;;  %v2177_v62 = vpop.permute.xlu2 %325 }
 0x13c   : > { %v399_v1 = vpop.permute.xlu1 %398  ;;  %v404_v2 = vrot.slane %v397_v61, 4  ;;  %900 = vperm.xlu2 %1968, %v2042_v0  }
 0x13d   : > { %v405_v4 = vrot.slane %v399_v1, 4 }
 0x13e   : > { %1759 = vmatmul.msk.bf16.vlgmr.msra.gmra.mxu3 %vm797_vm7, %v2175_v60  ;;  %1758 = vmatmul.msk.bf16.vlgmr.msra.gmra.mxu1 %vm797_vm7, %v2175_v60  ;;  %v1696_v36 = vld [vmem:[#allocation3 + $0x50] sm:$0xf] }
 0x13f   : > { %857 = vmatpush.bf16.msrb.mxu1 %v1745_v49  ;;  %878 = vmatpush.bf16.msrb.mxu3 %v1757_v59  ;;  %v411_v7 = vsel %vm409_vm8, %v399_v1, %v405_v4  ;;  %v408_v8 = vsel %vm337_vm0, %v404_v2, %v405_v4  ;;  %v1688_v9 = vld [vmem:[#allocation3 + $0x48] sm:$0xf]  ;;  %v1893_v10 = vld [vmem:[#allocation3 + $0x4c] sm:$0xf]  ;;  %v333_v49 = vrot.slane %v2177_v62, 4 }
 0x140   : > { %420 = vst [vmem:[#allocation3 + $0x38] sm:$0xf] %v411_v7  ;;  %v410_v12 = vsel %vm409_vm8, %v397_v61, %v408_v8  ;;  %v1894_v13 = vld [vmem:[#allocation3 + $0x50] sm:$0xf0]  ;;  %v1690_v15 = vld [vmem:[#allocation3 + $0x54] sm:$0xf0] }
 0x141   : > { %419 = vst [vmem:[#allocation3 + $0x30] sm:$0xff] %v410_v12  ;;  %v1689_v16 = vor.u32 %v1894_v13, %v1688_v9  ;;  %v1693_v17 = vor.u32 %v1893_v10, %v1690_v15  ;;  %1971 = vset.pattern.permute.xlu0 %v1998_v57  ;;  %v1672_v2 = vld [vmem:[#allocation3 + $0x20] sm:$0xf] }
 0x142   : > { %1969 = vset.pattern.permute.xlu1 %v1997_v32  ;;  %924 = vperm.xlu0 %1971, %v2055_v3   ;;  %v1883_v13 = vld [vmem:[%s2398_s1 + $0x4] sm:$0xf0] }
 0x143   : > { %858 = vmatpush.bf16.msrb.mxu1 %v1733_v6  ;;  %805 = vmatpush.bf16.msra.mxu0 %v1689_v16  ;;  %v403_v20 = vpop.permute.xlu0 %402  ;;  %v2186_v21 = vpop.permute.xlu2 %331 }
 0x144   : > { %833 = vmatpush.bf16.msra.mxu2 %v1693_v17  ;;  %v407_v24 = vrot.slane %v403_v20, 4  ;;  %v362_v25 = vpop.permute.xlu1 %361  ;;  %v336_v26 = vrot.slane %v2186_v21, 4  ;;  %904 = vperm.xlu1 %1969, %v2055_v3  }
 0x145   : > { %v369_v27 = vrot.slane %v362_v25, 4  ;;  %1970 = vset.pattern.permute.xlu2 %v1998_v57 }
 0x146   : > { %v412_v29 = vsel %vm337_vm0, %v406_v23, %v407_v24  ;;  %v414_v30 = vsel %vm409_vm8, %v403_v20, %v407_v24  ;;  %v344_v35 = vsel %vm339_vm9, %v2186_v21, %v336_v26  ;;  %920 = vperm.xlu2 %1970, %v2042_v0  }
 0x147   : > { %859 = vmatpush.bf16.msrb.mxu1 %v1721_v19  ;;  %v413_v33 = vsel %vm409_vm8, %v2150_v14, %v412_v29  ;;  %422 = vst [vmem:[#allocation3 + $0x44] sm:$0xf] %v414_v30  ;;  %v373_v34 = vsel %vm337_vm0, %v369_v27, %v370_v38  ;;  %v1895_v14 = vld [vmem:[#allocation3 + $0x58] sm:$0xf0]  ;;  %v1684_v44 = vld [vmem:[#allocation3 + $0x38] sm:$0xf] }
 0x148   : > { %421 = vst [vmem:[#allocation3 + $0x3c] sm:$0xff] %v413_v33  ;;  %v375_v39 = vsel %vm374_vm6, %v362_v25, %v373_v34  ;;  %v1697_v38 = vor.u32 %v1895_v14, %v1696_v36  ;;  %v1676_v46 = vld [vmem:[#allocation3 + $0x30] sm:$0xf]  ;;  %v1890_v52 = vld [vmem:[#allocation3 + $0x34] sm:$0xf] }
 0x149   : > { %384 = vst [vmem:[#allocation3 + $0x18] sm:$0xff] %v375_v39  ;;  %v229_v14 = vld [vmem:[%s2401_s4 + $0x1] sm:$0x7] }
 0x14a   : > { %352 = vst [vmem:[#allocation3 + $0x14] sm:$0xf] %v344_v35 }
 0x14b   : > { %860 = vmatpush.bf16.msrb.mxu1 %v1709_v31  ;;  %v366_v40 = vpop.permute.xlu0 %365 }
 0x14c   : > { %v371_v41 = vrot.slane %v366_v40, 4  ;;  %v368_v42 = vpop.permute.xlu1 %367 }
 0x14d   : > { %v372_v43 = vrot.slane %v368_v42, 4 }
 0x14e   : > { %v1892_v45 = vld [vmem:[#allocation3 + $0x40] sm:$0xf0]  ;;  %1760 = vmatmul.msk.bf16.vlgmr.msrb.gmra.mxu3 %vm797_vm7, %v2175_v60 }
 0x14f   : > { %861 = vmatpush.bf16.msrb.mxu1 %v1697_v38  ;;  %v377_v47 = vsel %vm337_vm0, %v371_v41, %v372_v43  ;;  %v379_v48 = vsel %vm374_vm6, %v368_v42, %v372_v43  ;;  %v1685_v50 = vor.u32 %v1892_v45, %v1684_v44  ;;  %v1891_v51 = vld [vmem:[#allocation3 + $0x38] sm:$0xf0]  ;;  %v1678_v53 = vld [vmem:[#allocation3 + $0x3c] sm:$0xf0]  ;;  %v2231_v41 = vperm.slane %v229_v14, 2 }
 0x150   : > { %v378_v54 = vsel %vm374_vm6, %v366_v40, %v377_v47  ;;  %387 = vst [vmem:[#allocation3 + $0x2c] sm:$0xf] %v379_v48  ;;  %v1677_v55 = vor.u32 %v1891_v51, %v1676_v46  ;;  %v1681_v56 = vor.u32 %v1890_v52, %v1678_v53  ;;  %v1664_v4 = vld [vmem:[#allocation3 + $0x18] sm:$0xf]  ;;  %v1887_v7 = vld [vmem:[#allocation3 + $0x1c] sm:$0xf] }
 0x151   : > { %386 = vst [vmem:[#allocation3 + $0x24] sm:$0xff] %v378_v54  ;;  %v1886_v16 = vld [vmem:[#allocation3 + $0x10] sm:$0xf0] }
 0x152   : > { %806 = vmatpush.bf16.msra.mxu0 %v1677_v55  ;;  %834 = vmatpush.bf16.msra.mxu2 %v1681_v56 }
 0x153   : > { %862 = vmatpush.bf16.msrb.mxu1 %v1685_v50  ;;  %v328_v58 = vpop.permute.xlu0 %327 }
 0x154   : > { %v334_v59 = vrot.slane %v328_v58, 4  ;;  %v330_v60 = vpop.permute.xlu1 %329 }
 0x155   : > { %v335_v61 = vrot.slane %v330_v60, 4 }
 0x156   : > { %v338_v63 = vsel %vm337_vm0, %v333_v49, %v334_v59  ;;  %v341_v1 = vsel %vm339_vm9, %v328_v58, %v334_v59 }
 0x157   : > { %v340_v5 = vsel %vm339_vm9, %v2177_v62, %v338_v63  ;;  %350 = vst [vmem:[#allocation3 + $0x8] sm:$0xf] %v341_v1  ;;  %v342_v3 = vsel %vm337_vm0, %v335_v61, %v336_v26  ;;  %v1889_v6 = vld [vmem:[#allocation3 + $0x28] sm:$0xf0]  ;;  %v1644_v62 = vld [vmem:[%s2398_s1] sm:$0xf] }
 0x158   : > { %349 = vst [vmem:[#allocation3] sm:$0xff] %v340_v5  ;;  %v343_v8 = vsel %vm339_vm9, %v330_v60, %v342_v3  ;;  %v1673_v0 = vor.u32 %v1889_v6, %v1672_v2  ;;  %v1888_v9 = vld [vmem:[#allocation3 + $0x20] sm:$0xf0]  ;;  %v1666_v10 = vld [vmem:[#allocation3 + $0x24] sm:$0xf0]  ;;  %v1645_v22 = vor.u32 %v1883_v13, %v1644_v62  ;;  %v2234_v61 = vperm.slane %v229_v14, 0 }
 0x159   : > { %351 = vst [vmem:[#allocation3 + $0xc] sm:$0xff] %v343_v8  ;;  %v1665_v11 = vor.u32 %v1888_v9, %v1664_v4  ;;  %v1669_v12 = vor.u32 %v1887_v7, %v1666_v10  ;;  %v2236_v63 = vperm.slane %v229_v14, 1 }
 0x15a   : > { %863 = vmatpush.bf16.msrb.mxu1 %v1673_v0 }
 0x15b   : > { %807 = vmatpush.bf16.msra.mxu0 %v1665_v11  ;;  %835 = vmatpush.bf16.msra.mxu2 %v1669_v12 }
 0x15e   : > { %v1660_v15 = vld [vmem:[#allocation3 + $0x8] sm:$0xf] }
 0x15f   : > { %v1661_v17 = vor.u32 %v1886_v16, %v1660_v15  ;;  %v1652_v18 = vld [vmem:[#allocation3] sm:$0xf]  ;;  %v1884_v19 = vld [vmem:[#allocation3 + $0x4] sm:$0xf] }
 0x160   : > { %v1885_v20 = vld [vmem:[#allocation3 + $0x8] sm:$0xf0]  ;;  %v1654_v21 = vld [vmem:[#allocation3 + $0xc] sm:$0xf0] }
 0x161   : > { %864 = vmatpush.bf16.msrb.mxu1 %v1661_v17  ;;  %v1653_v23 = vor.u32 %v1885_v20, %v1652_v18  ;;  %v1657_v24 = vor.u32 %v1884_v19, %v1654_v21 }
 0x163   : > { %808 = vmatpush.bf16.msra.mxu0 %v1653_v23  ;;  %836 = vmatpush.bf16.msra.mxu2 %v1657_v24 }
 0x164   : > { %865 = vmatmul.bf16.vlgmr.msrb.gmra.mxu1 %v1645_v22 }
 0x166   : > { %809 = vmatmul.bf16.vlgmr.msra.gmra.mxu0 %v1645_v22  ;;  %837 = vmatmul.bf16.vlgmr.msra.gmra.mxu2 %v1645_v22 }
 0x196   : > { %v901_v29 = vpop.permute.xlu2 %900 }
 0x1a0   : > { %v921_v32 = vpop.permute.xlu2 %920 }
 0x1ab   : > { %v887_v33 = vpop.permute.xlu0 %886 }
 0x1ac   : > { %v891_v35 = vpop.permute.xlu1 %890 }
 0x1b4   : > { %v925_v60 = vpop.permute.xlu0 %924 }
 0x1b6   : > { %v905_v56 = vpop.permute.xlu1 %904 }
 0x1bb   : > { %v824_v26 = vpop.f32.mrf.mxu1 }
 0x1c1   : > { %v852_v25 = vpop.f32.mrf.mxu3 }
 0x1c3   : > { %v826_v28 = vpop.f32.mrf.mxu1 }
 0x1c9   : > { %v854_v27 = vpop.f32.mrf.mxu3 }
 0x1d1   : > { %v880_v30 = vpop.f32.mrf.mxu3 }
 0x1d9   : > { %v882_v46 = vpop.f32.mrf.mxu3 }
 0x1e1   : > { %v866_v31 = vpop.f32.mrf.mxu1 }
 0x1e2   : > { %v881_v34 = vadd.f32 %v880_v30, %v866_v31 }
 0x1e3   : > { %v810_v36 = vpop.f32.mrf.mxu0 }
 0x1e4   : > { %v825_v37 = vadd.f32 %v824_v26, %v810_v36  ;;  %v895_v39 = vmul.f32 %v887_v33, %v881_v34 }
 0x1e6   : > { %v893_v38 = vmul.f32 %v887_v33, %v825_v37  ;;  %v909_v40 = vadd.f32 %v901_v29, %v895_v39 }
 0x1e8   : > { %v907_v42 = vadd.f32 %v901_v29, %v893_v38  ;;  %vm915_vm10 = vcmp.ge.f32.partialorder %v909_v40, 0.0  ;;  %v929_v43 = vmul.f32 %v921_v32, %v909_v40 }
 0x1e9   : > { %v838_v44 = vpop.f32.mrf.mxu2  ;;  %v868_v45 = vpop.f32.mrf.mxu1 }
 0x1ea   : > { %v935_v47 = vsel %vm915_vm10, %v909_v40, %v929_v43  ;;  %v853_v48 = vadd.f32 %v852_v25, %v838_v44  ;;  %v883_v51 = vadd.f32 %v882_v46, %v868_v45  ;;  %v927_v53 = vmul.f32 %v921_v32, %v907_v42 }
 0x1eb   : > { %v948_v50 = vmul.f32 %v2231_v41, %v935_v47  ;;  %v812_v52 = vpop.f32.mrf.mxu0  ;;  %vm913_vm11 = vcmp.ge.f32.partialorder %v907_v42, 0.0 }
 0x1ec   : > { %v894_v54 = vmul.f32 %v887_v33, %v853_v48  ;;  %v827_v55 = vadd.f32 %v826_v28, %v812_v52  ;;  %v898_v58 = vmul.f32 %v891_v35, %v883_v51  ;;  %v933_v2 = vsel %vm913_vm11, %v907_v42, %v927_v53 }
 0x1ed   : > { %v953_v57 = vpack.c.bf16 %v948_v50, %v948_v50  ;;  %v946_v0 = vmul.f32 %v2234_v61, %v933_v2 }
 0x1ee   : > { %v908_v49 = vadd.f32 %v901_v29, %v894_v54  ;;  %v896_v59 = vmul.f32 %v891_v35, %v827_v55  ;;  %v912_v1 = vadd.f32 %v905_v56, %v898_v58 }
 0x1ef   : > { %957 = vst [vmem:[#allocation2 + $0xc] sm:$0xf] %v953_v57 }
 0x1f0   : > { %vm914_vm12 = vcmp.ge.f32.partialorder %v908_v49, 0.0  ;;  %v928_v4 = vmul.f32 %v921_v32, %v908_v49  ;;  %v910_v5 = vadd.f32 %v905_v56, %v896_v59  ;;  %vm918_vm13 = vcmp.ge.f32.partialorder %v912_v1, 0.0 }
 0x1f1   : > { %v932_v3 = vmul.f32 %v925_v60, %v912_v1  ;;  %v840_v6 = vpop.f32.mrf.mxu2 }
 0x1f2   : > { %v934_v7 = vsel %vm914_vm12, %v908_v49, %v928_v4  ;;  %v855_v8 = vadd.f32 %v854_v27, %v840_v6  ;;  %v930_v11 = vmul.f32 %v925_v60, %v910_v5  ;;  %vm916_vm14 = vcmp.ge.f32.partialorder %v910_v5, 0.0 }
 0x1f3   : > { %v947_v9 = vmul.f32 %v2236_v63, %v934_v7  ;;  %v938_v10 = vsel %vm918_vm13, %v912_v1, %v932_v3 }
 0x1f4   : > { %v951_v12 = vmul.f32 %v2231_v41, %v938_v10  ;;  %v897_v62 = vmul.f32 %v891_v35, %v855_v8  ;;  %v936_v19 = vsel %vm916_vm14, %v910_v5, %v930_v11 }
 0x1f5   : > { %v952_v13 = vpack.c.bf16 %v947_v9, %v946_v0  ;;  %v949_v22 = vmul.f32 %v2234_v61, %v936_v19 }
 0x1f6   : > { %v955_v15 = vpack.c.bf16 %v951_v12, %v951_v12  ;;  %v911_v16 = vadd.f32 %v905_v56, %v897_v62  ;;  %v1173_v17 = vld [vmem:[#allocation2 + $0xc] sm:$0xff] }
 0x1f7   : > { %v1097_v18 = vld [vmem:[#allocation2 + $0xc] sm:$0xf]  ;;  %956 = vst [vmem:[#allocation2 + $0x4] sm:$0xff] %v952_v13  ;;  %1182 = vrot.lane.b32.xlu2 %v1173_v17, %s1988_s8  ;;  %1148 = vrot.lane.b32.xlu1 %v1173_v17, %s1989_s9 }
 0x1f8   : > { %959 = vst [vmem:[#allocation2 + $0x20] sm:$0xf] %v955_v15  ;;  %vm917_vm15 = vcmp.ge.f32.partialorder %v911_v16, 0.0  ;;  %v931_v20 = vmul.f32 %v925_v60, %v911_v16  ;;  %1146 = vrot.lane.b32.xlu0 %v952_v13, %s1989_s9 }
 0x1f9   : > { %1101 = vst [vmem:[#allocation3 + $0x68] sm:$0xf] %v1097_v18 }
 0x1fa   : > { %v937_v21 = vsel %vm917_vm15, %v911_v16, %v931_v20  ;;  %1100 = vst [vmem:[#allocation3 + $0x60] sm:$0xff] %v952_v13 }
 0x1fb   : > { %v950_v23 = vmul.f32 %v2236_v63, %v937_v21 }
 0x1fd   : > { %v954_v24 = vpack.c.bf16 %v950_v23, %v949_v22 }
 0x1fe   : > { %v1063_v25 = vld [vmem:[#allocation2 + $0x8] sm:$0xff]  ;;  %v1062_v27 = vld [vmem:[#allocation2] sm:$0xff] }
 0x1ff   : > { %958 = vst [vmem:[#allocation2 + $0x18] sm:$0xff] %v954_v24  ;;  %1114 = vrot.lane.b32.xlu2 %v1173_v17, %s1990_s10  ;;  %1180 = vrot.lane.b32.xlu1 %v952_v13, %s1988_s8  ;;  %v1099_v26 = vld [vmem:[#allocation2 + $0x20] sm:$0xf] }
 0x200   : > { %1072 = vrot.lane.b32.xlu0 %v1063_v25, %s1992_s12  ;;  %1103 = vst [vmem:[#allocation3 + $0x74] sm:$0xf] %v1099_v26  ;;  %v1175_v28 = vld [vmem:[#allocation2 + $0x20] sm:$0xff] }
 0x201   : > { %1102 = vst [vmem:[#allocation3 + $0x6c] sm:$0xff] %v954_v24 }
 0x206   : > { %v1031_v29 = vld [vmem:[#allocation2 + $0x1c] sm:$0xff]  ;;  %v1064_v30 = vld [vmem:[#allocation2 + $0x14] sm:$0xff] }
 0x207   : > { %1112 = vrot.lane.b32.xlu1 %v952_v13, %s1990_s10  ;;  %1070 = vrot.lane.b32.xlu2 %v1062_v27, %s1992_s12 }
 0x208   : > { %1036 = vrot.lane.b32.xlu0 %v1062_v27, %s1993_s13 }
 0x20f   : > { %1186 = vrot.lane.b32.xlu2 %v1175_v28, %s1988_s8  ;;  %1038 = vrot.lane.b32.xlu1 %v1063_v25, %s1993_s13 }
 0x210   : > { %1152 = vrot.lane.b32.xlu0 %v1175_v28, %s1989_s9 }
 0x217   : > { %1118 = vrot.lane.b32.xlu1 %v1175_v28, %s1990_s10  ;;  %1004 = vrot.lane.b32.xlu2 %v1063_v25, %s1994_s14 }
 0x218   : > { %970 = vrot.lane.b32.xlu0 %v1063_v25, %s1995_s15 }
 0x21f   : > { %1184 = vrot.lane.b32.xlu1 %v954_v24, %s1988_s8  ;;  %968 = vrot.lane.b32.xlu2 %v1062_v27, %s1995_s15 }
 0x220   : > { %1116 = vrot.lane.b32.xlu0 %v954_v24, %s1990_s10 }
 0x227   : > { %1002 = vrot.lane.b32.xlu1 %v1062_v27, %s1994_s14  ;;  %1150 = vrot.lane.b32.xlu2 %v954_v24, %s1989_s9 }
 0x228   : > { %1042 = vrot.lane.b32.xlu0 %v1031_v29, %s1993_s13 }
 0x22f   : > { %1074 = vrot.lane.b32.xlu1 %v1064_v30, %s1992_s12  ;;  %1076 = vrot.lane.b32.xlu2 %v1031_v29, %s1992_s12 }
 0x230   : > { %1006 = vrot.lane.b32.xlu0 %v1064_v30, %s1994_s14 }
 0x237   : > { %1008 = vrot.lane.b32.xlu1 %v1031_v29, %s1994_s14  ;;  %1040 = vrot.lane.b32.xlu2 %v1064_v30, %s1993_s13 }
 0x238   : > { %1214 = vrot.lane.b32.xlu0 %v952_v13, %s1991_s11 }
 0x23f   : > { %972 = vrot.lane.b32.xlu1 %v1064_v30, %s1995_s15  ;;  %974 = vrot.lane.b32.xlu2 %v1031_v29, %s1995_s15 }
 0x240   : > { %1220 = vrot.lane.b32.xlu0 %v1175_v28, %s1991_s11 }
 0x247   : > { %1216 = vrot.lane.b32.xlu1 %v1173_v17, %s1991_s11  ;;  %1218 = vrot.lane.b32.xlu2 %v954_v24, %s1991_s11 }
 0x251   : > { %v1183_v31 = vpop.permute.xlu2 %1182 }
 0x252   : > { %v1189_v33 = vrot.slane %v1183_v31, 4 }
 0x254   : > { %v1194_v34 = vsel %vm557_vm1, %v1183_v31, %v1189_v33 }
 0x255   : > { %1203 = vst [vmem:[#allocation3 + $0xb0] sm:$0xf] %v1194_v34 }
 0x259   : > { %v1115_v35 = vpop.permute.xlu2 %1114 }
 0x25a   : > { %v1121_v36 = vrot.slane %v1115_v35, 4 }
 0x25c   : > { %v1126_v37 = vsel %vm487_vm4, %v1115_v35, %v1121_v36  ;;  %v1863_v49 = vld [vmem:[#allocation3 + $0xb0] sm:$0xf] }
 0x25d   : > { %1135 = vst [vmem:[#allocation3 + $0x80] sm:$0xf] %v1126_v37 }
 0x261   : > { %v1071_v39 = vpop.permute.xlu2 %1070 }
 0x262   : > { %v1078_v54 = vrot.slane %v1071_v39, 4 }
 0x269   : > { %v1149_v14 = vpop.permute.xlu1 %1148  ;;  %v2277_v32 = vpop.permute.xlu2 %1186 }
 0x26a   : > { %v1155_v38 = vrot.slane %v1149_v14, 4  ;;  %v1191_v40 = vrot.slane %v2277_v32, 4  ;;  %v1147_v42 = vpop.permute.xlu0 %1146 }
 0x26b   : > { %v1154_v43 = vrot.slane %v1147_v42, 4 }
 0x26c   : > { %v1160_v44 = vsel %vm522_vm2, %v1149_v14, %v1155_v38  ;;  %v1197_v45 = vsel %vm557_vm1, %v2277_v32, %v1191_v40 }
 0x26d   : > { %1169 = vst [vmem:[#allocation3 + $0x98] sm:$0xf] %v1160_v44  ;;  %v1158_v46 = vsel %vm337_vm0, %v1154_v43, %v1155_v38 }
 0x26e   : > { %1205 = vst [vmem:[#allocation3 + $0xbc] sm:$0xf] %v1197_v45  ;;  %v1159_v47 = vsel %vm522_vm2, %v1147_v42, %v1158_v46  ;;  %v1839_v45 = vld [vmem:[#allocation3 + $0x80] sm:$0xf] }
 0x26f   : > { %1168 = vst [vmem:[#allocation3 + $0x90] sm:$0xff] %v1159_v47 }
 0x271   : > { %v1181_v48 = vpop.permute.xlu1 %1180  ;;  %v2287_v50 = vpop.permute.xlu2 %1004 }
 0x272   : > { %v1188_v51 = vrot.slane %v1181_v48, 4  ;;  %v1011_v52 = vrot.slane %v2287_v50, 4  ;;  %v1073_v53 = vpop.permute.xlu0 %1072 }
 0x273   : > { %v1079_v55 = vrot.slane %v1073_v53, 4 }
 0x274   : > { %v1192_v56 = vsel %vm337_vm0, %v1188_v51, %v1189_v33  ;;  %v1016_v57 = vsel %vm374_vm6, %v2287_v50, %v1011_v52  ;;  %v1851_v35 = vld [vmem:[#allocation3 + $0x98] sm:$0xf] }
 0x275   : > { %v1193_v58 = vsel %vm557_vm1, %v1181_v48, %v1192_v56  ;;  %1025 = vst [vmem:[#allocation3 + $0x20] sm:$0xf] %v1016_v57  ;;  %v1936_v59 = vld [vmem:[#allocation3 + $0xb8] sm:$0xf0]  ;;  %v1082_v60 = vsel %vm337_vm0, %v1078_v54, %v1079_v55  ;;  %v1084_v1 = vsel %vm444_vm5, %v1073_v53, %v1079_v55  ;;  %v1927_v54 = vld [vmem:[#allocation3 + $0x70] sm:$0xf0] }
 0x276   : > { %1202 = vst [vmem:[#allocation3 + $0xa8] sm:$0xff] %v1193_v58  ;;  %v1864_v2 = vor.u32 %v1936_v59, %v1863_v49  ;;  %v1083_v4 = vsel %vm444_vm5, %v1071_v39, %v1082_v60  ;;  %v1827_v55 = vld [vmem:[#allocation3 + $0x68] sm:$0xf] }
 0x277   : > { %1092 = vst [vmem:[#allocation3 + $0x48] sm:$0xff] %v1083_v4  ;;  %v1828_v32 = vor.u32 %v1927_v54, %v1827_v55 }
 0x278   : > { %1490 = vmatpush.bf16.msrb.mxu0 %v1864_v2  ;;  %1093 = vst [vmem:[#allocation3 + $0x50] sm:$0xf] %v1084_v1 }
 0x279   : > { %v1113_v5 = vpop.permute.xlu1 %1112  ;;  %v969_v3 = vpop.permute.xlu2 %968 }
 0x27a   : > { %v1120_v6 = vrot.slane %v1113_v5, 4  ;;  %v1037_v7 = vpop.permute.xlu0 %1036  ;;  %v976_v27 = vrot.slane %v969_v3, 4 }
 0x27b   : > { %v1044_v11 = vrot.slane %v1037_v7, 4 }
 0x27c   : > { %v1124_v8 = vsel %vm337_vm0, %v1120_v6, %v1121_v36 }
 0x27d   : > { %v1125_v0 = vsel %vm487_vm4, %v1113_v5, %v1124_v8  ;;  %v1855_v5 = vld [vmem:[#allocation3 + $0xa8] sm:$0xf] }
 0x27e   : > { %1134 = vst [vmem:[#allocation3 + $0x78] sm:$0xff] %v1125_v0 }
 0x27f   : > { %v1815_v6 = vld [vmem:[#allocation3 + $0x50] sm:$0xf] }
 0x281   : > { %v1039_v9 = vpop.permute.xlu1 %1038  ;;  %v1151_v10 = vpop.permute.xlu2 %1150 }
 0x282   : > { %v1045_v12 = vrot.slane %v1039_v9, 4  ;;  %v1156_v62 = vrot.slane %v1151_v10, 4  ;;  %v1153_v13 = vpop.permute.xlu0 %1152 }
 0x283   : > { %v1157_v15 = vrot.slane %v1153_v13, 4 }
 0x284   : > { %v1048_v16 = vsel %vm337_vm0, %v1044_v11, %v1045_v12  ;;  %v1050_v17 = vsel %vm409_vm8, %v1039_v9, %v1045_v12 }
 0x285   : > { %v1049_v18 = vsel %vm409_vm8, %v1037_v7, %v1048_v16  ;;  %1059 = vst [vmem:[#allocation3 + $0x38] sm:$0xf] %v1050_v17  ;;  %v1161_v19 = vsel %vm337_vm0, %v1156_v62, %v1157_v15  ;;  %v1163_v20 = vsel %vm522_vm2, %v1153_v13, %v1157_v15  ;;  %v1843_v16 = vld [vmem:[#allocation3 + $0x90] sm:$0xf]  ;;  %v1931_v17 = vld [vmem:[#allocation3 + $0x94] sm:$0xf] }
 0x286   : > { %1058 = vst [vmem:[#allocation3 + $0x30] sm:$0xff] %v1049_v18  ;;  %v1162_v21 = vsel %vm522_vm2, %v1151_v10, %v1161_v19 }
 0x287   : > { %1170 = vst [vmem:[#allocation3 + $0x9c] sm:$0xff] %v1162_v21 }
 0x288   : > { %1171 = vst [vmem:[#allocation3 + $0xa4] sm:$0xf] %v1163_v20 }
 0x289   : > { %v1119_v22 = vpop.permute.xlu1 %1118  ;;  %v2307_v23 = vpop.permute.xlu2 %1076 }
 0x28a   : > { %v1123_v24 = vrot.slane %v1119_v22, 4  ;;  %v1081_v25 = vrot.slane %v2307_v23, 4  ;;  %v971_v26 = vpop.permute.xlu0 %970 }
 0x28b   : > { %v977_v28 = vrot.slane %v971_v26, 4 }
 0x28c   : > { %v1129_v29 = vsel %vm487_vm4, %v1119_v22, %v1123_v24  ;;  %v1087_v30 = vsel %vm444_vm5, %v2307_v23, %v1081_v25  ;;  %v1819_v23 = vld [vmem:[#allocation3 + $0x60] sm:$0xf] }
 0x28d   : > { %1137 = vst [vmem:[#allocation3 + $0x8c] sm:$0xf] %v1129_v29  ;;  %v980_v31 = vsel %vm337_vm0, %v976_v27, %v977_v28  ;;  %v982_v33 = vsel %vm339_vm9, %v971_v26, %v977_v28  ;;  %v1831_v28 = vld [vmem:[#allocation3 + $0x78] sm:$0xf]  ;;  %v1928_v29 = vld [vmem:[#allocation3 + $0x7c] sm:$0xf] }
 0x28e   : > { %1095 = vst [vmem:[#allocation3 + $0x5c] sm:$0xf] %v1087_v30  ;;  %v981_v34 = vsel %vm339_vm9, %v969_v3, %v980_v31  ;;  %v1934_v3 = vld [vmem:[#allocation3 + $0xac] sm:$0xf]  ;;  %v1932_v62 = vld [vmem:[#allocation3 + $0x98] sm:$0xf0] }
 0x28f   : > { %990 = vst [vmem:[#allocation3] sm:$0xff] %v981_v34  ;;  %v1933_v36 = vld [vmem:[#allocation3 + $0xa0] sm:$0xf0]  ;;  %v1845_v13 = vld [vmem:[#allocation3 + $0x9c] sm:$0xf0]  ;;  %v1844_v19 = vor.u32 %v1932_v62, %v1843_v16  ;;  %v1999_v16 = vmov 5  }
 0x290   : > { %991 = vst [vmem:[#allocation3 + $0x8] sm:$0xf] %v982_v33  ;;  %v1852_v37 = vor.u32 %v1933_v36, %v1851_v35  ;;  %v1848_v20 = vor.u32 %v1931_v17, %v1845_v13  ;;  %v1926_v33 = vld [vmem:[#allocation3 + $0x68] sm:$0xf0]  ;;  %v1821_v34 = vld [vmem:[#allocation3 + $0x6c] sm:$0xf0]  ;;  %1972 = vset.pattern.permute.xlu1 %v1999_v16  ;;  %1973 = vset.pattern.permute.xlu2 %v1999_v16 }
 0x291   : > { %v1185_v39 = vpop.permute.xlu1 %1184  ;;  %v1041_v14 = vpop.permute.xlu2 %1040  ;;  %v1803_v35 = vld [vmem:[#allocation3 + $0x38] sm:$0xf] }
 0x292   : > { %v1190_v38 = vrot.slane %v1185_v39, 4  ;;  %1491 = vmatpush.bf16.msrb.mxu0 %v1852_v37  ;;  %v1117_v42 = vpop.permute.xlu0 %1116  ;;  %v1046_v60 = vrot.slane %v1041_v14, 4 }
 0x293   : > { %v1122_v43 = vrot.slane %v1117_v42, 4 }
 0x294   : > { %v1195_v44 = vsel %vm337_vm0, %v1190_v38, %v1191_v40  ;;  %v1930_v46 = vld [vmem:[#allocation3 + $0x88] sm:$0xf0] }
 0x295   : > { %v1196_v47 = vsel %vm557_vm1, %v1185_v39, %v1195_v44  ;;  %v1127_v48 = vsel %vm337_vm0, %v1122_v43, %v1123_v24  ;;  %v1840_v51 = vor.u32 %v1930_v46, %v1839_v45  ;;  %v1924_v59 = vld [vmem:[#allocation3 + $0x58] sm:$0xf0] }
 0x296   : > { %1204 = vst [vmem:[#allocation3 + $0xb4] sm:$0xff] %v1196_v47  ;;  %v1128_v53 = vsel %vm487_vm4, %v1117_v42, %v1127_v48  ;;  %v1816_v50 = vor.u32 %v1924_v59, %v1815_v6  ;;  %v1820_v42 = vor.u32 %v1926_v33, %v1819_v23  ;;  %v1807_v47 = vld [vmem:[#allocation3 + $0x48] sm:$0xf]  ;;  %v1922_v48 = vld [vmem:[#allocation3 + $0x4c] sm:$0xf] }
 0x297   : > { %1136 = vst [vmem:[#allocation3 + $0x84] sm:$0xff] %v1128_v53  ;;  %1492 = vmatpush.bf16.msrb.mxu0 %v1840_v51  ;;  %v1771_v33 = vld [vmem:[#allocation3] sm:$0xf] }
 0x299   : > { %v1003_v56 = vpop.permute.xlu1 %1002  ;;  %v2324_v57 = vpop.permute.xlu2 %974 }
 0x29a   : > { %v1010_v58 = vrot.slane %v1003_v56, 4  ;;  %v979_v40 = vrot.slane %v2324_v57, 4  ;;  %v1043_v49 = vpop.permute.xlu0 %1042 }
 0x29b   : > { %1493 = vmatpush.bf16.msrb.mxu0 %v1828_v32  ;;  %v1047_v1 = vrot.slane %v1043_v49, 4 }
 0x29c   : > { %v1014_v2 = vsel %vm337_vm0, %v1010_v58, %v1011_v52  ;;  %v985_v4 = vsel %vm339_vm9, %v2324_v57, %v979_v40 }
 0x29d   : > { %v1015_v7 = vsel %vm374_vm6, %v1003_v56, %v1014_v2  ;;  %993 = vst [vmem:[#allocation3 + $0x14] sm:$0xf] %v985_v4  ;;  %v1935_v8 = vld [vmem:[#allocation3 + $0xb0] sm:$0xf0]  ;;  %v1857_v0 = vld [vmem:[#allocation3 + $0xb4] sm:$0xf0]  ;;  %v1051_v9 = vsel %vm337_vm0, %v1046_v60, %v1047_v1  ;;  %v1053_v10 = vsel %vm409_vm8, %v1043_v49, %v1047_v1 }
 0x29e   : > { %1024 = vst [vmem:[#allocation3 + $0x18] sm:$0xff] %v1015_v7  ;;  %v1856_v52 = vor.u32 %v1935_v8, %v1855_v5  ;;  %v1860_v11 = vor.u32 %v1934_v3, %v1857_v0  ;;  %v1052_v12 = vsel %vm409_vm8, %v1041_v14, %v1051_v9  ;;  %v1929_v22 = vld [vmem:[#allocation3 + $0x80] sm:$0xf0]  ;;  %v1833_v24 = vld [vmem:[#allocation3 + $0x84] sm:$0xf0] }
 0x29f   : > { %1060 = vst [vmem:[#allocation3 + $0x3c] sm:$0xff] %v1052_v12  ;;  %1494 = vmatpush.bf16.msrb.mxu0 %v1816_v50  ;;  %v1832_v30 = vor.u32 %v1929_v22, %v1831_v28  ;;  %v1836_v31 = vor.u32 %v1928_v29, %v1833_v24  ;;  %v1925_v14 = vld [vmem:[#allocation3 + $0x64] sm:$0xf]  ;;  %v1795_v60 = vld [vmem:[#allocation3 + $0x30] sm:$0xf] }
 0x2a0   : > { %1434 = vmatpush.bf16.msra.mxu3 %v1856_v52  ;;  %1462 = vmatpush.bf16.msrb.mxu2 %v1860_v11  ;;  %1061 = vst [vmem:[#allocation3 + $0x44] sm:$0xf] %v1053_v10  ;;  %v1824_v43 = vor.u32 %v1925_v14, %v1821_v34  ;;  %v1919_v1 = vld [vmem:[#allocation3 + $0x34] sm:$0xf]  ;;  %v1791_v0 = vld [vmem:[#allocation3 + $0x20] sm:$0xf] }
 0x2a1   : > { %v1075_v15 = vpop.permute.xlu1 %1074  ;;  %v1219_v49 = vpop.permute.xlu2 %1218  ;;  %v1913_v34 = vld [vmem:[#allocation3 + $0x4] sm:$0xf] }
 0x2a2   : > { %v1080_v18 = vrot.slane %v1075_v15, 4  ;;  %v1007_v21 = vpop.permute.xlu0 %1006  ;;  %v1224_v6 = vrot.slane %v1219_v49, 4 }
 0x2a4   : > { %v1085_v26 = vsel %vm337_vm0, %v1080_v18, %v1081_v25  ;;  %1435 = vmatpush.bf16.msra.mxu3 %v1844_v19  ;;  %1463 = vmatpush.bf16.msrb.mxu2 %v1848_v20  ;;  %v1012_v25 = vrot.slane %v1007_v21, 4  ;;  %v1915_v18 = vld [vmem:[#allocation3 + $0x10] sm:$0xf0]  ;;  %v1976_v19 = vld [vmem:[%s2400_s3] sm:$0xff]  ;;  %v1977_v20 = vld [vmem:[%s2400_s3 + $0x8] sm:$0xff] }
 0x2a5   : > { %v1086_v27 = vsel %vm444_vm5, %v1075_v15, %v1085_v26  ;;  %v1783_v10 = vld [vmem:[#allocation3 + $0x18] sm:$0xf]  ;;  %v1916_v13 = vld [vmem:[#allocation3 + $0x1c] sm:$0xf]  ;;  %1529 = vperm.xlu1 %1972, %v1976_v19   ;;  %1533 = vperm.xlu2 %1973, %v1977_v20  }
 0x2a6   : > { %1094 = vst [vmem:[#allocation3 + $0x54] sm:$0xff] %v1086_v27  ;;  %v1920_v32 = vld [vmem:[#allocation3 + $0x38] sm:$0xf0]  ;;  %v1797_v58 = vld [vmem:[#allocation3 + $0x3c] sm:$0xf0] }
 0x2a7   : > { %v1921_v36 = vld [vmem:[#allocation3 + $0x40] sm:$0xf0]  ;;  %v1796_v4 = vor.u32 %v1920_v32, %v1795_v60  ;;  %v1800_v5 = vor.u32 %v1919_v1, %v1797_v58  ;;  %v1763_v26 = vld [vmem:[%s2399_s2] sm:$0xf]  ;;  %v1912_v27 = vld [vmem:[%s2399_s2 + $0x4] sm:$0xf0] }
 0x2a8   : > { %1436 = vmatpush.bf16.msra.mxu3 %v1832_v30  ;;  %1464 = vmatpush.bf16.msrb.mxu2 %v1836_v31  ;;  %v1804_v37 = vor.u32 %v1921_v36, %v1803_v35  ;;  %v1764_v35 = vor.u32 %v1912_v27, %v1763_v26  ;;  %v2000_v36 = vmov 6  }
 0x2a9   : > { %v1009_v39 = vpop.permute.xlu1 %1008  ;;  %1974 = vset.pattern.permute.xlu0 %v2000_v36 }
 0x2aa   : > { %v1013_v38 = vrot.slane %v1009_v39, 4  ;;  %1495 = vmatpush.bf16.msrb.mxu0 %v1804_v37  ;;  %v2342_v44 = vpop.permute.xlu0 %1214  ;;  %1543 = vperm.xlu0 %1974, %v1976_v19  }
 0x2ab   : > { %v1222_v28 = vrot.slane %v2342_v44, 4 }
 0x2ac   : > { %v1017_v45 = vsel %vm337_vm0, %v1012_v25, %v1013_v38  ;;  %v1019_v46 = vsel %vm374_vm6, %v1009_v39, %v1013_v38  ;;  %1437 = vmatpush.bf16.msra.mxu3 %v1820_v42  ;;  %1465 = vmatpush.bf16.msrb.mxu2 %v1824_v43  ;;  %v1911_v38 = vld [vmem:[%s2399_s2 + $0x4] sm:$0xf] }
 0x2ad   : > { %v1018_v51 = vsel %vm374_vm6, %v1007_v21, %v1017_v45  ;;  %1027 = vst [vmem:[#allocation3 + $0x2c] sm:$0xf] %v1019_v46  ;;  %v1923_v53 = vld [vmem:[#allocation3 + $0x50] sm:$0xf0]  ;;  %v1809_v54 = vld [vmem:[#allocation3 + $0x54] sm:$0xf0]  ;;  %1975 = vset.pattern.permute.xlu1 %v2000_v36 }
 0x2ae   : > { %1026 = vst [vmem:[#allocation3 + $0x24] sm:$0xff] %v1018_v51  ;;  %v1808_v55 = vor.u32 %v1923_v53, %v1807_v47  ;;  %v1812_v56 = vor.u32 %v1922_v48, %v1809_v54  ;;  %v1779_v21 = vld [vmem:[#allocation3 + $0x8] sm:$0xf]  ;;  %1547 = vperm.xlu1 %1975, %v1977_v20  }
 0x2af   : > { %v1780_v24 = vor.u32 %v1915_v18, %v1779_v21 }
 0x2b0   : > { %1438 = vmatpush.bf16.msra.mxu3 %v1808_v55  ;;  %1466 = vmatpush.bf16.msrb.mxu2 %v1812_v56 }
 0x2b1   : > { %v973_v59 = vpop.permute.xlu1 %972 }
 0x2b2   : > { %v978_v2 = vrot.slane %v973_v59, 4  ;;  %v1221_v3 = vpop.permute.xlu0 %1220 }
 0x2b3   : > { %v1225_v7 = vrot.slane %v1221_v3, 4 }
 0x2b4   : > { %v983_v8 = vsel %vm337_vm0, %v978_v2, %v979_v40  ;;  %1439 = vmatpush.bf16.msra.mxu3 %v1796_v4  ;;  %1467 = vmatpush.bf16.msrb.mxu2 %v1800_v5  ;;  %v1918_v9 = vld [vmem:[#allocation3 + $0x28] sm:$0xf0]  ;;  %v1518_v4 = vld [vmem:[%s2065_s30 + $0x4] sm:$0xff] }
 0x2b5   : > { %v984_v50 = vsel %vm339_vm9, %v973_v59, %v983_v8  ;;  %v1792_v52 = vor.u32 %v1918_v9, %v1791_v0  ;;  %v1229_v11 = vsel %vm337_vm0, %v1224_v6, %v1225_v7  ;;  %v1231_v12 = vsel %vm592_vm3, %v1221_v3, %v1225_v7  ;;  %v1917_v62 = vld [vmem:[#allocation3 + $0x20] sm:$0xf0]  ;;  %v1785_v15 = vld [vmem:[#allocation3 + $0x24] sm:$0xf0] }
 0x2b6   : > { %992 = vst [vmem:[#allocation3 + $0xc] sm:$0xff] %v984_v50  ;;  %v1230_v57 = vsel %vm592_vm3, %v1219_v49, %v1229_v11  ;;  %v1784_v40 = vor.u32 %v1917_v62, %v1783_v10  ;;  %v1788_v17 = vor.u32 %v1916_v13, %v1785_v15  ;;  %v1523_v7 = vunpack.c.h.bf16 %v1518_v4  ;;  %v1519_v11 = vld [vmem:[%s2065_s30 + $0xc] sm:$0xf] }
 0x2b7   : > { %1496 = vmatpush.bf16.msrb.mxu0 %v1792_v52  ;;  %1238 = vst [vmem:[#allocation3 + $0xcc] sm:$0xff] %v1230_v57  ;;  %v1522_v62 = vunpack.c.l.bf16 %v1518_v4  ;;  %v1520_v57 = vld [vmem:[%s2065_s30 + $0x18] sm:$0xff] }
 0x2b8   : > { %1239 = vst [vmem:[#allocation3 + $0xd4] sm:$0xf] %v1231_v12  ;;  %1440 = vmatpush.bf16.msra.mxu3 %v1784_v40  ;;  %1468 = vmatpush.bf16.msrb.mxu2 %v1788_v17  ;;  %v1524_v17 = vunpack.c.l.bf16 %v1519_v11 }
 0x2b9   : > { %v1217_v22 = vpop.permute.xlu1 %1216 }
 0x2ba   : > { %v1223_v29 = vrot.slane %v1217_v22, 4 }
 0x2bb   : > { %1497 = vmatpush.bf16.msrb.mxu0 %v1780_v24 }
 0x2bc   : > { %v1226_v30 = vsel %vm337_vm0, %v1222_v28, %v1223_v29  ;;  %v1228_v31 = vsel %vm592_vm3, %v1217_v22, %v1223_v29  ;;  %v1526_v22 = vunpack.c.h.bf16 %v1520_v57 }
 0x2bd   : > { %v1227_v37 = vsel %vm592_vm3, %v2342_v44, %v1226_v30  ;;  %1237 = vst [vmem:[#allocation3 + $0xc8] sm:$0xf] %v1228_v31  ;;  %v1914_v39 = vld [vmem:[#allocation3 + $0x8] sm:$0xf0]  ;;  %v1773_v23 = vld [vmem:[#allocation3 + $0xc] sm:$0xf0] }
 0x2be   : > { %1236 = vst [vmem:[#allocation3 + $0xc0] sm:$0xff] %v1227_v37  ;;  %v1772_v14 = vor.u32 %v1914_v39, %v1771_v33  ;;  %v1776_v25 = vor.u32 %v1913_v34, %v1773_v23  ;;  %1498 = vmatmul.bf16.vlgmr.msrb.gmra.mxu0 %v1764_v35  ;;  %v1938_v42 = vld [vmem:[#allocation3 + $0xc8] sm:$0xf0]  ;;  %v1765_v44 = vld [vmem:[%s2399_s2 + $0x8] sm:$0xf0]  ;;  %v1525_v33 = vunpack.c.l.bf16 %v1520_v57 }
 0x2bf   : > { %v1869_v47 = vld [vmem:[#allocation3 + $0xcc] sm:$0xf0]  ;;  %v1939_v53 = vld [vmem:[#allocation3 + $0xd0] sm:$0xf0]  ;;  %v1768_v55 = vor.u32 %v1911_v38, %v1765_v44  ;;  %v1521_v31 = vld [vmem:[%s2065_s30 + $0x20] sm:$0xf] }
 0x2c0   : > { %1441 = vmatpush.bf16.msra.mxu3 %v1772_v14  ;;  %1469 = vmatpush.bf16.msrb.mxu2 %v1776_v25  ;;  %v1527_v14 = vunpack.c.l.bf16 %v1521_v31 }
 0x2c3   : > { %1442 = vmatmul.bf16.vlgmr.msra.gmra.mxu3 %v1764_v35  ;;  %1470 = vmatmul.bf16.vlgmr.msrb.gmra.mxu2 %v1764_v35 }
 0x2c4   : > { %v1875_v43 = vld [vmem:[#allocation3 + $0xc8] sm:$0xf] }
 0x2c5   : > { %v1867_v45 = vld [vmem:[#allocation3 + $0xc0] sm:$0xf]  ;;  %v1937_v46 = vld [vmem:[#allocation3 + $0xc4] sm:$0xf]  ;;  %v1876_v54 = vor.u32 %v1939_v53, %v1875_v43 }
 0x2c6   : > { %v1868_v48 = vor.u32 %v1938_v42, %v1867_v45  ;;  %v1872_v51 = vor.u32 %v1937_v46, %v1869_v47 }
 0x2c8   : > { %1455 = vmatpush.bf16.msrb.mxu3 %v1868_v48  ;;  %1483 = vmatpush.bf16.msra.mxu1 %v1872_v51 }
 0x2cb   : > { %1878 = vmatmul.msk.bf16.vlgmr.msra.gmra.mxu1 %vm797_vm7, %v1768_v55 }
 0x2cc   : > { %1511 = vmatpush.bf16.msrb.mxu1 %v1876_v54 }
 0x2d3   : > { %1877 = vmatmul.msk.bf16.vlgmr.msrb.gmra.mxu3 %vm797_vm7, %v1768_v55 }
 0x2db   : > { %1879 = vmatmul.msk.bf16.vlgmr.msrb.gmra.mxu1 %vm797_vm7, %v1768_v55 }
 0x2ff   : > { %v1534_v50 = vpop.permute.xlu2 %1533 }
 0x317   : > { %v1530_v60 = vpop.permute.xlu1 %1529 }
 0x31c   : > { %v1544_v5 = vpop.permute.xlu0 %1543 }
 0x320   : > { %v1548_v19 = vpop.permute.xlu1 %1547 }
 0x33b   : > { %v1499_v0 = vpop.f32.mrf.mxu0 }
 0x343   : > { %v1501_v34 = vpop.f32.mrf.mxu0 }
 0x346   : > { %v1443_v56 = vpop.f32.mrf.mxu3  ;;  %v1471_v58 = vpop.f32.mrf.mxu2 }
 0x348   : > { %v1485_v32 = vpop.f32.mrf.mxu1 }
 0x349   : > { %v1486_v49 = vadd.f32 %v1485_v32, %v1471_v58 }
 0x34b   : > { %v1537_v2 = vmul.f32 %v1530_v60, %v1486_v49 }
 0x34d   : > { %v1551_v8 = vadd.f32 %v1544_v5, %v1537_v2 }
 0x34e   : > { %v1445_v59 = vpop.f32.mrf.mxu3  ;;  %v1473_v3 = vpop.f32.mrf.mxu2 }
 0x34f   : > { %v1557_v15 = vadd.f32 %v1551_v8, %v1523_v7 }
 0x350   : > { %v1487_v1 = vpop.f32.mrf.mxu1 }
 0x351   : > { %v1488_v9 = vadd.f32 %v1487_v1, %v1473_v3  ;;  %v1563_v24 = vmul.f32 %v1557_v15, %v2236_v63 }
 0x353   : > { %v1540_v16 = vmul.f32 %v1534_v50, %v1488_v9 }
 0x355   : > { %v1554_v27 = vadd.f32 %v1548_v19, %v1540_v16 }
 0x356   : > { %v1457_v6 = vpop.f32.mrf.mxu3 }
 0x357   : > { %v1458_v10 = vadd.f32 %v1457_v6, %v1443_v56  ;;  %v1560_v25 = vadd.f32 %v1554_v27, %v1526_v22 }
 0x358   : > { %v1513_v52 = vpop.f32.mrf.mxu1 }
 0x359   : > { %v1536_v12 = vmul.f32 %v1530_v60, %v1458_v10  ;;  %v1514_v13 = vadd.f32 %v1513_v52, %v1499_v0  ;;  %v1566_v46 = vmul.f32 %v1560_v25, %v2236_v63 }
 0x35b   : > { %v1550_v40 = vadd.f32 %v1544_v5, %v1536_v12  ;;  %v1538_v18 = vmul.f32 %v1530_v60, %v1514_v13 }
 0x35d   : > { %v1556_v20 = vadd.f32 %v1550_v40, %v1522_v62  ;;  %v1552_v21 = vadd.f32 %v1544_v5, %v1538_v18 }
 0x35e   : > { %v1459_v26 = vpop.f32.mrf.mxu3 }
 0x35f   : > { %v1562_v28 = vmul.f32 %v1556_v20, %v2234_v61  ;;  %v1558_v29 = vadd.f32 %v1552_v21, %v1524_v17  ;;  %v1460_v30 = vadd.f32 %v1459_v26, %v1445_v59 }
 0x360   : > { %v1515_v35 = vpop.f32.mrf.mxu1 }
 0x361   : > { %v1572_v36 = vpack.c.bf16 %v1563_v24, %v1562_v28  ;;  %v1564_v37 = vmul.f32 %v1558_v29, %v2231_v41  ;;  %v1539_v39 = vmul.f32 %v1534_v50, %v1460_v30  ;;  %v1516_v23 = vadd.f32 %v1515_v35, %v1501_v34 }
 0x363   : > { %1576 = vst [vmem:[%s2049_s25 + $0x4] sm:$0xff] %v1572_v36  ;;  %v1573_v38 = vpack.c.bf16 %v1564_v37, %v1564_v37  ;;  %v1553_v42 = vadd.f32 %v1548_v19, %v1539_v39  ;;  %v1541_v43 = vmul.f32 %v1534_v50, %v1516_v23 }
 0x365   : > { %1577 = vst [vmem:[%s2049_s25 + $0xc] sm:$0xf] %v1573_v38  ;;  %v1559_v44 = vadd.f32 %v1553_v42, %v1525_v33  ;;  %v1555_v45 = vadd.f32 %v1548_v19, %v1541_v43 }
 0x367   : > { %v1565_v47 = vmul.f32 %v1559_v44, %v2234_v61  ;;  %v1561_v48 = vadd.f32 %v1555_v45, %v1527_v14 }
 0x369   : > { %v1574_v51 = vpack.c.bf16 %v1566_v46, %v1565_v47  ;;  %v1567_v53 = vmul.f32 %v1561_v48, %v2231_v41 }
 0x36b   : > { %1578 = vst [vmem:[%s2049_s25 + $0x18] sm:$0xff] %v1574_v51  ;;  %v1575_v54 = vpack.c.bf16 %v1567_v53, %v1567_v53 }
 0x36d   : > { %1579 = vst [vmem:[%s2049_s25 + $0x20] sm:$0xf] %v1575_v54 }
 0x36e PF: > { %s15_s18 = sadd.s32 1, %s1984_s18  }
 0x36f   : > { %p12_p4 = scmp.ge.s32.totalorder %s15_s18, 4  }
 0x371   :  { %14 = sbr.rel (!%p12_p4) target bundleno = 1 (0x1), region = 70 }

</bundles_post_ra>
